<compile_context>
chip_gen: v5e
topology: v5e:2x2
jax: 0.10.0
libtpu: 0.0.40
codegen_flags: <defaults>
</compile_context>

<pallas_src>
import functools

import jax
import jax.numpy as jnp
from jax import lax
from jax.experimental import pallas as pl
from jax.experimental.pallas import tpu as pltpu

INPUT_SIZE = 1
HIDDEN_SIZE = 128
NUM_BRANCHES = 4
OUTPUT_SIZE = 10
V_TH = 1.0


def dh_snn_kernel(branch_ref, tau_n_ref, tau_m_ref, v0_ref, w_out_ref,
                  b_out_ref, out_ref, u_ref, v_ref, s_ref, acc_ref,
                  *, t_chunk, start_idx):
    """Grid = (batch_blocks, time_chunks).

    branch_ref: (T_CHUNK, B_BLK, H) precomputed branch currents for this chunk
    tau_n_ref:  (1, H)  dendritic time constants (pre-sigmoid)
    tau_m_ref:  (1, H)  somatic time constants (pre-sigmoid)
    v0_ref:     (B_BLK, H) initial membrane potential
    w_out_ref:  (H, O)  readout weight (transposed), b_out_ref: (1, O)
    out_ref:    (B_BLK, O) logits (written at the last time chunk)
    u/v/s/acc_ref: (B_BLK, H) VMEM scratch carried across time chunks
    """
    tc = pl.program_id(1)
    nt = pl.num_programs(1)
    b_blk, h = u_ref.shape

    # Loop-invariant decay factors: sigmoid once, pre-broadcast to (B_BLK, H)
    # once per chunk (JAX does not CSE broadcast_in_dim inside the loop).
    beta = jnp.broadcast_to(jax.nn.sigmoid(tau_n_ref[...]), (b_blk, h))
    alpha = jnp.broadcast_to(jax.nn.sigmoid(tau_m_ref[...]), (b_blk, h))
    one_m_beta = 1.0 - beta
    one_m_alpha = 1.0 - alpha

    @pl.when(tc == 0)
    def _init():
        u_ref[...] = jnp.zeros_like(u_ref)
        v_ref[...] = v0_ref[...]
        s_ref[...] = jnp.zeros_like(s_ref)
        acc_ref[...] = jnp.zeros_like(acc_ref)

    chunk_start = tc * t_chunk  # global timestep of local t == 0

    def run_chunk(accumulate):
        def step(t, carry):
            u, v, s, acc = carry
            bi = branch_ref[t]                               # (B_BLK, H)
            u = beta * u + one_m_beta * bi                   # dendritic currents
            v = (alpha * v + one_m_alpha * u
                 - (s if V_TH == 1.0 else V_TH * s))         # membrane update
            s = (v > V_TH).astype(jnp.float32)               # heaviside spike
            return (u, v, s, accumulate(t, acc, s))

        u, v, s, acc = lax.fori_loop(
            0, t_chunk, step,
            (u_ref[...], v_ref[...], s_ref[...], acc_ref[...]),
            unroll=min(t_chunk, 8))
        u_ref[...] = u
        v_ref[...] = v
        s_ref[...] = s
        acc_ref[...] = acc

    all_before = (chunk_start + t_chunk) <= start_idx   # no step integrates
    all_after = chunk_start >= start_idx                 # every step integrates

    @pl.when(all_before)
    def _chunk_no_acc():
        run_chunk(lambda t, acc, s: acc)

    @pl.when(all_after)
    def _chunk_acc():
        run_chunk(lambda t, acc, s: acc + s)

    @pl.when(jnp.logical_and(jnp.logical_not(all_before),
                             jnp.logical_not(all_after)))
    def _chunk_straddle():
        run_chunk(lambda t, acc, s: acc + jnp.where(
            chunk_start + t >= start_idx, s, jnp.zeros_like(s)))

    @pl.when(tc == nt - 1)
    def _readout():
        out_ref[...] = (jnp.dot(acc_ref[...], w_out_ref[...],
                                preferred_element_type=jnp.float32)
                        + b_out_ref[...])


def _largest_divisor(n, cap):
    for c in range(min(n, cap), 0, -1):
        if n % c == 0:
            return c
    return 1


def dh_snn_forward(x, w_branch, tau_n_eff, tau_m, v0, w_out, b_out,
                   *, b_block=8, t_chunk=None):
    """x: (B, T, F) float32, matching the PyTorch [batch, time, feature] input."""
    B, T, F = x.shape
    H = w_branch.shape[1]
    O = w_out.shape[1]
    if B % b_block != 0:
        b_block = B  # fall back to a single batch block
    if t_chunk is None or T % t_chunk != 0:
        t_chunk = _largest_divisor(T, cap=64)
    start_idx = T * 2 // 3

    # Whole-sequence branch projection as ONE (T*B, F) x (F, H) contraction,
    # time-major so the grid streams time chunks; x never enters the kernel.
    branch_in = jnp.einsum('btf,fh->tbh', x.astype(jnp.float32), w_branch)

    grid = (B // b_block, T // t_chunk)
    kernel = functools.partial(dh_snn_kernel, t_chunk=t_chunk,
                               start_idx=start_idx)

    return pl.pallas_call(
        kernel,
        out_shape=jax.ShapeDtypeStruct((B, O), jnp.float32),
        grid=grid,
        in_specs=[
            pl.BlockSpec((t_chunk, b_block, H), lambda b, t: (t, b, 0)),
            pl.BlockSpec((1, H), lambda b, t: (0, 0)),
            pl.BlockSpec((1, H), lambda b, t: (0, 0)),
            pl.BlockSpec((b_block, H), lambda b, t: (b, 0)),
            pl.BlockSpec((H, O), lambda b, t: (0, 0)),
            pl.BlockSpec((1, O), lambda b, t: (0, 0)),
        ],
        out_specs=pl.BlockSpec((b_block, O), lambda b, t: (b, 0)),
        scratch_shapes=[
            pltpu.VMEM((b_block, H), jnp.float32),  # u  (dendritic currents)
            pltpu.VMEM((b_block, H), jnp.float32),  # v  (membrane potential)
            pltpu.VMEM((b_block, H), jnp.float32),  # s  (spike output)
            pltpu.VMEM((b_block, H), jnp.float32),  # acc (integrated spikes)
        ],
        compiler_params=pltpu.CompilerParams(
            dimension_semantics=("parallel", "arbitrary")),
    )(branch_in, tau_n_eff, tau_m, v0, w_out, b_out)


def make_params(key):
    bs = HIDDEN_SIZE // NUM_BRANCHES
    keys = jax.random.split(key, 6)

    # Branch linear weights: 4 x (bs, INPUT_SIZE), no bias. Fused to (F, H):
    # branch i feeds hidden columns [i*bs, (i+1)*bs).
    lim = 1.0 / jnp.sqrt(jnp.float32(INPUT_SIZE))
    w_branches = jax.random.uniform(
        keys[0], (NUM_BRANCHES, bs, INPUT_SIZE), jnp.float32, -lim, lim)
    w_branch = jnp.concatenate(
        [w_branches[i].T for i in range(NUM_BRANCHES)], axis=1)

    # tau_n: Parameter(num_branches, hidden_size) ~ U(2, 6).
    tau_n = jax.random.uniform(keys[1], (NUM_BRANCHES, HIDDEN_SIZE),
                               jnp.float32, 2.0, 6.0)
    # TODO(synk): the original PyTorch code broadcasts sigmoid(tau_n[i]) (128,)
    # against the branch current (B, 32), which is shape-incompatible as
    # written; we use the branch-aligned slice tau_n[i, i*bs:(i+1)*bs].
    tau_n_eff = jnp.concatenate(
        [tau_n[i, i * bs:(i + 1) * bs] for i in range(NUM_BRANCHES)]
    ).reshape(1, HIDDEN_SIZE)

    tau_m = jax.random.uniform(keys[2], (HIDDEN_SIZE,), jnp.float32,
                               0.0, 4.0).reshape(1, HIDDEN_SIZE)

    # Output layer: Linear(HIDDEN_SIZE, OUTPUT_SIZE) with bias (weight stored
    # transposed as (H, O)).
    lim_o = 1.0 / jnp.sqrt(jnp.float32(HIDDEN_SIZE))
    w_out = jax.random.uniform(keys[3], (HIDDEN_SIZE, OUTPUT_SIZE),
                               jnp.float32, -lim_o, lim_o)
    b_out = jax.random.uniform(keys[4], (1, OUTPUT_SIZE),
                               jnp.float32, -lim_o, lim_o)
    return w_branch, tau_n_eff, tau_m, w_out, b_out, keys[5]


def reference_forward(x, w_branch, tau_n_eff, tau_m, v0, w_out, b_out):
    """Pure-JAX reference mirroring the PyTorch forward semantics."""
    B, T, F = x.shape
    start_idx = T * 2 // 3
    beta = jax.nn.sigmoid(tau_n_eff)
    alpha = jax.nn.sigmoid(tau_m)
    u = jnp.zeros((B, HIDDEN_SIZE), jnp.float32)
    v = v0
    s = jnp.zeros((B, HIDDEN_SIZE), jnp.float32)
    acc = jnp.zeros((B, HIDDEN_SIZE), jnp.float32)
    for t in range(T):
        bi = x[:, t, :] @ w_branch
        u = beta * u + (1.0 - beta) * bi
        v = alpha * v + (1.0 - alpha) * u - V_TH * s
        s = (v > V_TH).astype(jnp.float32)
        if t >= start_idx:
            acc = acc + s
    return acc @ w_out + b_out


if __name__ == "__main__":
    key = jax.random.PRNGKey(0)
    w_branch, tau_n_eff, tau_m, w_out, b_out, key = make_params(key)

    # Small but representative: batch multiple of 8 (full f32 sublanes), time
    # chosen so the integration window start (T*2//3 = 26) straddles a chunk.
    BATCH, SEQ = 16, 40
    kx, kv = jax.random.split(key)
    x = jax.random.uniform(kx, (BATCH, SEQ, INPUT_SIZE), jnp.float32)
    # membrane_potential = torch.rand(batch, hidden) -> deterministic uniform here
    v0 = jax.random.uniform(kv, (BATCH, HIDDEN_SIZE), jnp.float32)

    out = dh_snn_forward(x, w_branch, tau_n_eff, tau_m, v0, w_out, b_out,
                         b_block=8, t_chunk=8)
    out = jax.block_until_ready(out)

    ref = reference_forward(x, w_branch, tau_n_eff, tau_m, v0, w_out, b_out)
    assert out.shape == (BATCH, OUTPUT_SIZE)
    assert jnp.allclose(out, ref, atol=1e-4, rtol=1e-4)

    print("KERNEL_OK")
</pallas_src>

<mosaic_0001>
module attributes {stable_mosaic.version = 11 : i64} {
  func.func @dh_snn_kernel(%arg0: i32, %arg1: i32, %arg2: memref<8x8x128xf32, #tpu.memory_space<vmem>>, %arg3: memref<1x128xf32, #tpu.memory_space<vmem>>, %arg4: memref<1x128xf32, #tpu.memory_space<vmem>>, %arg5: memref<8x128xf32, #tpu.memory_space<vmem>>, %arg6: memref<128x10xf32, #tpu.memory_space<vmem>>, %arg7: memref<1x10xf32, #tpu.memory_space<vmem>>, %arg8: memref<8x10xf32, #tpu.memory_space<vmem>>, %arg9: memref<8x128xf32, #tpu.memory_space<vmem>>, %arg10: memref<8x128xf32, #tpu.memory_space<vmem>>, %arg11: memref<8x128xf32, #tpu.memory_space<vmem>>, %arg12: memref<8x128xf32, #tpu.memory_space<vmem>>) attributes {dimension_semantics = [#tpu.dimension_semantics<parallel>, #tpu.dimension_semantics<arbitrary>], iteration_bounds = array<i64: 2, 5>, scalar_prefetch = 0 : i64, scratch_operands = 4 : i64, tpu.core_type = #tpu.core_type<tc>, window_params = [{transform_indices = @transform_0, window_bounds = array<i64: 8, 8, 128>}, {pipeline_mode = #tpu.pipeline_mode<synchronous>, transform_indices = @transform_1, window_bounds = array<i64: 1, 128>}, {pipeline_mode = #tpu.pipeline_mode<synchronous>, transform_indices = @transform_2, window_bounds = array<i64: 1, 128>}, {transform_indices = @transform_3, window_bounds = array<i64: 8, 128>}, {pipeline_mode = #tpu.pipeline_mode<synchronous>, transform_indices = @transform_4, window_bounds = array<i64: 128, 10>}, {pipeline_mode = #tpu.pipeline_mode<synchronous>, transform_indices = @transform_5, window_bounds = array<i64: 1, 10>}, {transform_indices = @transform_6, window_bounds = array<i64: 8, 10>}]} {
    %c0 = arith.constant 0 : index
    %c0_0 = arith.constant 0 : index
    %0 = vector.load %arg3[%c0, %c0_0] : memref<1x128xf32, #tpu.memory_space<vmem>>, vector<1x128xf32>
    %1 = arith.negf %0 : vector<1x128xf32>
    %2 = math.exp %1 : vector<1x128xf32>
    %cst = arith.constant 1.000000e+00 : f32
    %3 = vector.broadcast %cst : f32 to vector<1x128xf32>
    %4 = arith.addf %3, %2 : vector<1x128xf32>
    %5 = arith.divf %3, %4 : vector<1x128xf32>
    %6 = vector.shape_cast %5 : vector<1x128xf32> to vector<1x128xf32>
    %7 = vector.broadcast %6 : vector<1x128xf32> to vector<8x128xf32>
    %c0_1 = arith.constant 0 : index
    %c0_2 = arith.constant 0 : index
    %8 = vector.load %arg4[%c0_1, %c0_2] : memref<1x128xf32, #tpu.memory_space<vmem>>, vector<1x128xf32>
    %9 = arith.negf %8 : vector<1x128xf32>
    %10 = math.exp %9 : vector<1x128xf32>
    %cst_3 = arith.constant 1.000000e+00 : f32
    %11 = vector.broadcast %cst_3 : f32 to vector<1x128xf32>
    %12 = arith.addf %11, %10 : vector<1x128xf32>
    %13 = arith.divf %11, %12 : vector<1x128xf32>
    %14 = vector.shape_cast %13 : vector<1x128xf32> to vector<1x128xf32>
    %15 = vector.broadcast %14 : vector<1x128xf32> to vector<8x128xf32>
    %cst_4 = arith.constant 1.000000e+00 : f32
    %16 = vector.broadcast %cst_4 : f32 to vector<8x128xf32>
    %17 = arith.subf %16, %7 : vector<8x128xf32>
    %cst_5 = arith.constant 1.000000e+00 : f32
    %18 = vector.broadcast %cst_5 : f32 to vector<8x128xf32>
    %19 = arith.subf %18, %15 : vector<8x128xf32>
    %c0_i32 = arith.constant 0 : i32
    %20 = arith.cmpi eq, %arg1, %c0_i32 : i32
    %21 = arith.extui %20 : i1 to i32
    %c0_i32_6 = arith.constant 0 : i32
    %22 = arith.cmpi ne, %21, %c0_i32_6 : i32
    scf.if %22 {
      %cst_14 = arith.constant 0.000000e+00 : f32
      %39 = vector.broadcast %cst_14 : f32 to vector<8x128xf32>
      %c0_15 = arith.constant 0 : index
      %c0_16 = arith.constant 0 : index
      %40 = vector.load %arg9[%c0_15, %c0_16] : memref<8x128xf32, #tpu.memory_space<vmem>>, vector<8x128xf32>
      tpu.vector_store %arg9[%c0_15, %c0_16], %39 {strides = array<i32>} : memref<8x128xf32, #tpu.memory_space<vmem>>, vector<8x128xf32>,
      %c0_17 = arith.constant 0 : index
      %c0_18 = arith.constant 0 : index
      %41 = vector.load %arg5[%c0_17, %c0_18] : memref<8x128xf32, #tpu.memory_space<vmem>>, vector<8x128xf32>
      %c0_19 = arith.constant 0 : index
      %c0_20 = arith.constant 0 : index
      %42 = vector.load %arg10[%c0_19, %c0_20] : memref<8x128xf32, #tpu.memory_space<vmem>>, vector<8x128xf32>
      tpu.vector_store %arg10[%c0_19, %c0_20], %41 {strides = array<i32>} : memref<8x128xf32, #tpu.memory_space<vmem>>, vector<8x128xf32>,
      %cst_21 = arith.constant 0.000000e+00 : f32
      %43 = vector.broadcast %cst_21 : f32 to vector<8x128xf32>
      %c0_22 = arith.constant 0 : index
      %c0_23 = arith.constant 0 : index
      %44 = vector.load %arg11[%c0_22, %c0_23] : memref<8x128xf32, #tpu.memory_space<vmem>>, vector<8x128xf32>
      tpu.vector_store %arg11[%c0_22, %c0_23], %43 {strides = array<i32>} : memref<8x128xf32, #tpu.memory_space<vmem>>, vector<8x128xf32>,
      %cst_24 = arith.constant 0.000000e+00 : f32
      %45 = vector.broadcast %cst_24 : f32 to vector<8x128xf32>
      %c0_25 = arith.constant 0 : index
      %c0_26 = arith.constant 0 : index
      %46 = vector.load %arg12[%c0_25, %c0_26] : memref<8x128xf32, #tpu.memory_space<vmem>>, vector<8x128xf32>
      tpu.vector_store %arg12[%c0_25, %c0_26], %45 {strides = array<i32>} : memref<8x128xf32, #tpu.memory_space<vmem>>, vector<8x128xf32>,
    } else {
    }
    %c8_i32 = arith.constant 8 : i32
    %23 = arith.muli %arg1, %c8_i32 : i32
    %c8_i32_7 = arith.constant 8 : i32
    %24 = arith.addi %23, %c8_i32_7 : i32
    %c26_i32 = arith.constant 26 : i32
    %25 = arith.cmpi sle, %24, %c26_i32 : i32
    %c26_i32_8 = arith.constant 26 : i32
    %26 = arith.cmpi sge, %23, %c26_i32_8 : i32
    %27 = arith.extui %25 : i1 to i32
    %c0_i32_9 = arith.constant 0 : i32
    %28 = arith.cmpi ne, %27, %c0_i32_9 : i32
    scf.if %28 {
      %c0_14 = arith.constant 0 : index
      %c0_15 = arith.constant 0 : index
      %39 = vector.load %arg9[%c0_14, %c0_15] : memref<8x128xf32, #tpu.memory_space<vmem>>, vector<8x128xf32>
      %c0_16 = arith.constant 0 : index
      %c0_17 = arith.constant 0 : index
      %40 = vector.load %arg10[%c0_16, %c0_17] : memref<8x128xf32, #tpu.memory_space<vmem>>, vector<8x128xf32>
      %c0_18 = arith.constant 0 : index
      %c0_19 = arith.constant 0 : index
      %41 = vector.load %arg11[%c0_18, %c0_19] : memref<8x128xf32, #tpu.memory_space<vmem>>, vector<8x128xf32>
      %c0_20 = arith.constant 0 : index
      %c0_21 = arith.constant 0 : index
      %42 = vector.load %arg12[%c0_20, %c0_21] : memref<8x128xf32, #tpu.memory_space<vmem>>, vector<8x128xf32>
      %c0_i32_22 = arith.constant 0 : i32
      %43 = arith.index_cast %c0_i32_22 : i32 to index
      %c0_23 = arith.constant 0 : index
      %c0_24 = arith.constant 0 : index
      %44 = vector.load %arg2[%43, %c0_23, %c0_24] : memref<8x8x128xf32, #tpu.memory_space<vmem>>, vector<1x8x128xf32>
      %45 = vector.shape_cast %44 : vector<1x8x128xf32> to vector<8x128xf32>
      %46 = arith.mulf %7, %39 : vector<8x128xf32>
      %47 = arith.mulf %17, %45 : vector<8x128xf32>
      %48 = arith.addf %46, %47 : vector<8x128xf32>
      %49 = arith.mulf %15, %40 : vector<8x128xf32>
      %50 = arith.mulf %19, %48 : vector<8x128xf32>
      %51 = arith.addf %49, %50 : vector<8x128xf32>
      %52 = arith.subf %51, %41 : vector<8x128xf32>
      %cst_25 = arith.constant 1.000000e+00 : f32
      %53 = vector.broadcast %cst_25 : f32 to vector<8x128xf32>
      %54 = arith.cmpf ogt, %52, %53 : vector<8x128xf32>
      %55 = arith.extui %54 : vector<8x128xi1> to vector<8x128xi32>
      %56 = arith.sitofp %55 : vector<8x128xi32> to vector<8x128xf32>
      %c1_i32 = arith.constant 1 : i32
      %57 = arith.index_cast %c1_i32 : i32 to index
      %c0_26 = arith.constant 0 : index
      %c0_27 = arith.constant 0 : index
      %58 = vector.load %arg2[%57, %c0_26, %c0_27] : memref<8x8x128xf32, #tpu.memory_space<vmem>>, vector<1x8x128xf32>
      %59 = vector.shape_cast %58 : vector<1x8x128xf32> to vector<8x128xf32>
      %60 = arith.mulf %7, %48 : vector<8x128xf32>
      %61 = arith.mulf %17, %59 : vector<8x128xf32>
      %62 = arith.addf %60, %61 : vector<8x128xf32>
      %63 = arith.mulf %15, %52 : vector<8x128xf32>
      %64 = arith.mulf %19, %62 : vector<8x128xf32>
      %65 = arith.addf %63, %64 : vector<8x128xf32>
      %66 = arith.subf %65, %56 : vector<8x128xf32>
      %cst_28 = arith.constant 1.000000e+00 : f32
      %67 = vector.broadcast %cst_28 : f32 to vector<8x128xf32>
      %68 = arith.cmpf ogt, %66, %67 : vector<8x128xf32>
      %69 = arith.extui %68 : vector<8x128xi1> to vector<8x128xi32>
      %70 = arith.sitofp %69 : vector<8x128xi32> to vector<8x128xf32>
      %c2_i32 = arith.constant 2 : i32
      %71 = arith.index_cast %c2_i32 : i32 to index
      %c0_29 = arith.constant 0 : index
      %c0_30 = arith.constant 0 : index
      %72 = vector.load %arg2[%71, %c0_29, %c0_30] : memref<8x8x128xf32, #tpu.memory_space<vmem>>, vector<1x8x128xf32>
      %73 = vector.shape_cast %72 : vector<1x8x128xf32> to vector<8x128xf32>
      %74 = arith.mulf %7, %62 : vector<8x128xf32>
      %75 = arith.mulf %17, %73 : vector<8x128xf32>
      %76 = arith.addf %74, %75 : vector<8x128xf32>
      %77 = arith.mulf %15, %66 : vector<8x128xf32>
      %78 = arith.mulf %19, %76 : vector<8x128xf32>
      %79 = arith.addf %77, %78 : vector<8x128xf32>
      %80 = arith.subf %79, %70 : vector<8x128xf32>
      %cst_31 = arith.constant 1.000000e+00 : f32
      %81 = vector.broadcast %cst_31 : f32 to vector<8x128xf32>
      %82 = arith.cmpf ogt, %80, %81 : vector<8x128xf32>
      %83 = arith.extui %82 : vector<8x128xi1> to vector<8x128xi32>
      %84 = arith.sitofp %83 : vector<8x128xi32> to vector<8x128xf32>
      %c3_i32 = arith.constant 3 : i32
      %85 = arith.index_cast %c3_i32 : i32 to index
      %c0_32 = arith.constant 0 : index
      %c0_33 = arith.constant 0 : index
      %86 = vector.load %arg2[%85, %c0_32, %c0_33] : memref<8x8x128xf32, #tpu.memory_space<vmem>>, vector<1x8x128xf32>
      %87 = vector.shape_cast %86 : vector<1x8x128xf32> to vector<8x128xf32>
      %88 = arith.mulf %7, %76 : vector<8x128xf32>
      %89 = arith.mulf %17, %87 : vector<8x128xf32>
      %90 = arith.addf %88, %89 : vector<8x128xf32>
      %91 = arith.mulf %15, %80 : vector<8x128xf32>
      %92 = arith.mulf %19, %90 : vector<8x128xf32>
      %93 = arith.addf %91, %92 : vector<8x128xf32>
      %94 = arith.subf %93, %84 : vector<8x128xf32>
      %cst_34 = arith.constant 1.000000e+00 : f32
      %95 = vector.broadcast %cst_34 : f32 to vector<8x128xf32>
      %96 = arith.cmpf ogt, %94, %95 : vector<8x128xf32>
      %97 = arith.extui %96 : vector<8x128xi1> to vector<8x128xi32>
      %98 = arith.sitofp %97 : vector<8x128xi32> to vector<8x128xf32>
      %c4_i32_35 = arith.constant 4 : i32
      %99 = arith.index_cast %c4_i32_35 : i32 to index
      %c0_36 = arith.constant 0 : index
      %c0_37 = arith.constant 0 : index
      %100 = vector.load %arg2[%99, %c0_36, %c0_37] : memref<8x8x128xf32, #tpu.memory_space<vmem>>, vector<1x8x128xf32>
      %101 = vector.shape_cast %100 : vector<1x8x128xf32> to vector<8x128xf32>
      %102 = arith.mulf %7, %90 : vector<8x128xf32>
      %103 = arith.mulf %17, %101 : vector<8x128xf32>
      %104 = arith.addf %102, %103 : vector<8x128xf32>
      %105 = arith.mulf %15, %94 : vector<8x128xf32>
      %106 = arith.mulf %19, %104 : vector<8x128xf32>
      %107 = arith.addf %105, %106 : vector<8x128xf32>
      %108 = arith.subf %107, %98 : vector<8x128xf32>
      %cst_38 = arith.constant 1.000000e+00 : f32
      %109 = vector.broadcast %cst_38 : f32 to vector<8x128xf32>
      %110 = arith.cmpf ogt, %108, %109 : vector<8x128xf32>
      %111 = arith.extui %110 : vector<8x128xi1> to vector<8x128xi32>
      %112 = arith.sitofp %111 : vector<8x128xi32> to vector<8x128xf32>
      %c5_i32 = arith.constant 5 : i32
      %113 = arith.index_cast %c5_i32 : i32 to index
      %c0_39 = arith.constant 0 : index
      %c0_40 = arith.constant 0 : index
      %114 = vector.load %arg2[%113, %c0_39, %c0_40] : memref<8x8x128xf32, #tpu.memory_space<vmem>>, vector<1x8x128xf32>
      %115 = vector.shape_cast %114 : vector<1x8x128xf32> to vector<8x128xf32>
      %116 = arith.mulf %7, %104 : vector<8x128xf32>
      %117 = arith.mulf %17, %115 : vector<8x128xf32>
      %118 = arith.addf %116, %117 : vector<8x128xf32>
      %119 = arith.mulf %15, %108 : vector<8x128xf32>
      %120 = arith.mulf %19, %118 : vector<8x128xf32>
      %121 = arith.addf %119, %120 : vector<8x128xf32>
      %122 = arith.subf %121, %112 : vector<8x128xf32>
      %cst_41 = arith.constant 1.000000e+00 : f32
      %123 = vector.broadcast %cst_41 : f32 to vector<8x128xf32>
      %124 = arith.cmpf ogt, %122, %123 : vector<8x128xf32>
      %125 = arith.extui %124 : vector<8x128xi1> to vector<8x128xi32>
      %126 = arith.sitofp %125 : vector<8x128xi32> to vector<8x128xf32>
      %c6_i32 = arith.constant 6 : i32
      %127 = arith.index_cast %c6_i32 : i32 to index
      %c0_42 = arith.constant 0 : index
      %c0_43 = arith.constant 0 : index
      %128 = vector.load %arg2[%127, %c0_42, %c0_43] : memref<8x8x128xf32, #tpu.memory_space<vmem>>, vector<1x8x128xf32>
      %129 = vector.shape_cast %128 : vector<1x8x128xf32> to vector<8x128xf32>
      %130 = arith.mulf %7, %118 : vector<8x128xf32>
      %131 = arith.mulf %17, %129 : vector<8x128xf32>
      %132 = arith.addf %130, %131 : vector<8x128xf32>
      %133 = arith.mulf %15, %122 : vector<8x128xf32>
      %134 = arith.mulf %19, %132 : vector<8x128xf32>
      %135 = arith.addf %133, %134 : vector<8x128xf32>
      %136 = arith.subf %135, %126 : vector<8x128xf32>
      %cst_44 = arith.constant 1.000000e+00 : f32
      %137 = vector.broadcast %cst_44 : f32 to vector<8x128xf32>
      %138 = arith.cmpf ogt, %136, %137 : vector<8x128xf32>
      %139 = arith.extui %138 : vector<8x128xi1> to vector<8x128xi32>
      %140 = arith.sitofp %139 : vector<8x128xi32> to vector<8x128xf32>
      %c7_i32 = arith.constant 7 : i32
      %141 = arith.index_cast %c7_i32 : i32 to index
      %c0_45 = arith.constant 0 : index
      %c0_46 = arith.constant 0 : index
      %142 = vector.load %arg2[%141, %c0_45, %c0_46] : memref<8x8x128xf32, #tpu.memory_space<vmem>>, vector<1x8x128xf32>
      %143 = vector.shape_cast %142 : vector<1x8x128xf32> to vector<8x128xf32>
      %144 = arith.mulf %7, %132 : vector<8x128xf32>
      %145 = arith.mulf %17, %143 : vector<8x128xf32>
      %146 = arith.addf %144, %145 : vector<8x128xf32>
      %147 = arith.mulf %15, %136 : vector<8x128xf32>
      %148 = arith.mulf %19, %146 : vector<8x128xf32>
      %149 = arith.addf %147, %148 : vector<8x128xf32>
      %150 = arith.subf %149, %140 : vector<8x128xf32>
      %cst_47 = arith.constant 1.000000e+00 : f32
      %151 = vector.broadcast %cst_47 : f32 to vector<8x128xf32>
      %152 = arith.cmpf ogt, %150, %151 : vector<8x128xf32>
      %153 = arith.extui %152 : vector<8x128xi1> to vector<8x128xi32>
      %154 = arith.sitofp %153 : vector<8x128xi32> to vector<8x128xf32>
      %c8_i32_48 = arith.constant 8 : i32
      %c0_49 = arith.constant 0 : index
      %c0_50 = arith.constant 0 : index
      %155 = vector.load %arg9[%c0_49, %c0_50] : memref<8x128xf32, #tpu.memory_space<vmem>>, vector<8x128xf32>
      tpu.vector_store %arg9[%c0_49, %c0_50], %146 {strides = array<i32>} : memref<8x128xf32, #tpu.memory_space<vmem>>, vector<8x128xf32>,
      %c0_51 = arith.constant 0 : index
      %c0_52 = arith.constant 0 : index
      %156 = vector.load %arg10[%c0_51, %c0_52] : memref<8x128xf32, #tpu.memory_space<vmem>>, vector<8x128xf32>
      tpu.vector_store %arg10[%c0_51, %c0_52], %150 {strides = array<i32>} : memref<8x128xf32, #tpu.memory_space<vmem>>, vector<8x128xf32>,
      %c0_53 = arith.constant 0 : index
      %c0_54 = arith.constant 0 : index
      %157 = vector.load %arg11[%c0_53, %c0_54] : memref<8x128xf32, #tpu.memory_space<vmem>>, vector<8x128xf32>
      tpu.vector_store %arg11[%c0_53, %c0_54], %154 {strides = array<i32>} : memref<8x128xf32, #tpu.memory_space<vmem>>, vector<8x128xf32>,
      %c0_55 = arith.constant 0 : index
      %c0_56 = arith.constant 0 : index
      %158 = vector.load %arg12[%c0_55, %c0_56] : memref<8x128xf32, #tpu.memory_space<vmem>>, vector<8x128xf32>
      tpu.vector_store %arg12[%c0_55, %c0_56], %42 {strides = array<i32>} : memref<8x128xf32, #tpu.memory_space<vmem>>, vector<8x128xf32>,
    } else {
    }
    %29 = arith.extui %26 : i1 to i32
    %c0_i32_10 = arith.constant 0 : i32
    %30 = arith.cmpi ne, %29, %c0_i32_10 : i32
    scf.if %30 {
      %c0_14 = arith.constant 0 : index
      %c0_15 = arith.constant 0 : index
      %39 = vector.load %arg9[%c0_14, %c0_15] : memref<8x128xf32, #tpu.memory_space<vmem>>, vector<8x128xf32>
      %c0_16 = arith.constant 0 : index
      %c0_17 = arith.constant 0 : index
      %40 = vector.load %arg10[%c0_16, %c0_17] : memref<8x128xf32, #tpu.memory_space<vmem>>, vector<8x128xf32>
      %c0_18 = arith.constant 0 : index
      %c0_19 = arith.constant 0 : index
      %41 = vector.load %arg11[%c0_18, %c0_19] : memref<8x128xf32, #tpu.memory_space<vmem>>, vector<8x128xf32>
      %c0_20 = arith.constant 0 : index
      %c0_21 = arith.constant 0 : index
      %42 = vector.load %arg12[%c0_20, %c0_21] : memref<8x128xf32, #tpu.memory_space<vmem>>, vector<8x128xf32>
      %c0_i32_22 = arith.constant 0 : i32
      %43 = arith.index_cast %c0_i32_22 : i32 to index
      %c0_23 = arith.constant 0 : index
      %c0_24 = arith.constant 0 : index
      %44 = vector.load %arg2[%43, %c0_23, %c0_24] : memref<8x8x128xf32, #tpu.memory_space<vmem>>, vector<1x8x128xf32>
      %45 = vector.shape_cast %44 : vector<1x8x128xf32> to vector<8x128xf32>
      %46 = arith.mulf %7, %39 : vector<8x128xf32>
      %47 = arith.mulf %17, %45 : vector<8x128xf32>
      %48 = arith.addf %46, %47 : vector<8x128xf32>
      %49 = arith.mulf %15, %40 : vector<8x128xf32>
      %50 = arith.mulf %19, %48 : vector<8x128xf32>
      %51 = arith.addf %49, %50 : vector<8x128xf32>
      %52 = arith.subf %51, %41 : vector<8x128xf32>
      %cst_25 = arith.constant 1.000000e+00 : f32
      %53 = vector.broadcast %cst_25 : f32 to vector<8x128xf32>
      %54 = arith.cmpf ogt, %52, %53 : vector<8x128xf32>
      %55 = arith.extui %54 : vector<8x128xi1> to vector<8x128xi32>
      %56 = arith.sitofp %55 : vector<8x128xi32> to vector<8x128xf32>
      %57 = arith.addf %42, %56 : vector<8x128xf32>
      %c1_i32 = arith.constant 1 : i32
      %58 = arith.index_cast %c1_i32 : i32 to index
      %c0_26 = arith.constant 0 : index
      %c0_27 = arith.constant 0 : index
      %59 = vector.load %arg2[%58, %c0_26, %c0_27] : memref<8x8x128xf32, #tpu.memory_space<vmem>>, vector<1x8x128xf32>
      %60 = vector.shape_cast %59 : vector<1x8x128xf32> to vector<8x128xf32>
      %61 = arith.mulf %7, %48 : vector<8x128xf32>
      %62 = arith.mulf %17, %60 : vector<8x128xf32>
      %63 = arith.addf %61, %62 : vector<8x128xf32>
      %64 = arith.mulf %15, %52 : vector<8x128xf32>
      %65 = arith.mulf %19, %63 : vector<8x128xf32>
      %66 = arith.addf %64, %65 : vector<8x128xf32>
      %67 = arith.subf %66, %56 : vector<8x128xf32>
      %cst_28 = arith.constant 1.000000e+00 : f32
      %68 = vector.broadcast %cst_28 : f32 to vector<8x128xf32>
      %69 = arith.cmpf ogt, %67, %68 : vector<8x128xf32>
      %70 = arith.extui %69 : vector<8x128xi1> to vector<8x128xi32>
      %71 = arith.sitofp %70 : vector<8x128xi32> to vector<8x128xf32>
      %72 = arith.addf %57, %71 : vector<8x128xf32>
      %c2_i32 = arith.constant 2 : i32
      %73 = arith.index_cast %c2_i32 : i32 to index
      %c0_29 = arith.constant 0 : index
      %c0_30 = arith.constant 0 : index
      %74 = vector.load %arg2[%73, %c0_29, %c0_30] : memref<8x8x128xf32, #tpu.memory_space<vmem>>, vector<1x8x128xf32>
      %75 = vector.shape_cast %74 : vector<1x8x128xf32> to vector<8x128xf32>
      %76 = arith.mulf %7, %63 : vector<8x128xf32>
      %77 = arith.mulf %17, %75 : vector<8x128xf32>
      %78 = arith.addf %76, %77 : vector<8x128xf32>
      %79 = arith.mulf %15, %67 : vector<8x128xf32>
      %80 = arith.mulf %19, %78 : vector<8x128xf32>
      %81 = arith.addf %79, %80 : vector<8x128xf32>
      %82 = arith.subf %81, %71 : vector<8x128xf32>
      %cst_31 = arith.constant 1.000000e+00 : f32
      %83 = vector.broadcast %cst_31 : f32 to vector<8x128xf32>
      %84 = arith.cmpf ogt, %82, %83 : vector<8x128xf32>
      %85 = arith.extui %84 : vector<8x128xi1> to vector<8x128xi32>
      %86 = arith.sitofp %85 : vector<8x128xi32> to vector<8x128xf32>
      %87 = arith.addf %72, %86 : vector<8x128xf32>
      %c3_i32 = arith.constant 3 : i32
      %88 = arith.index_cast %c3_i32 : i32 to index
      %c0_32 = arith.constant 0 : index
      %c0_33 = arith.constant 0 : index
      %89 = vector.load %arg2[%88, %c0_32, %c0_33] : memref<8x8x128xf32, #tpu.memory_space<vmem>>, vector<1x8x128xf32>
      %90 = vector.shape_cast %89 : vector<1x8x128xf32> to vector<8x128xf32>
      %91 = arith.mulf %7, %78 : vector<8x128xf32>
      %92 = arith.mulf %17, %90 : vector<8x128xf32>
      %93 = arith.addf %91, %92 : vector<8x128xf32>
      %94 = arith.mulf %15, %82 : vector<8x128xf32>
      %95 = arith.mulf %19, %93 : vector<8x128xf32>
      %96 = arith.addf %94, %95 : vector<8x128xf32>
      %97 = arith.subf %96, %86 : vector<8x128xf32>
      %cst_34 = arith.constant 1.000000e+00 : f32
      %98 = vector.broadcast %cst_34 : f32 to vector<8x128xf32>
      %99 = arith.cmpf ogt, %97, %98 : vector<8x128xf32>
      %100 = arith.extui %99 : vector<8x128xi1> to vector<8x128xi32>
      %101 = arith.sitofp %100 : vector<8x128xi32> to vector<8x128xf32>
      %102 = arith.addf %87, %101 : vector<8x128xf32>
      %c4_i32_35 = arith.constant 4 : i32
      %103 = arith.index_cast %c4_i32_35 : i32 to index
      %c0_36 = arith.constant 0 : index
      %c0_37 = arith.constant 0 : index
      %104 = vector.load %arg2[%103, %c0_36, %c0_37] : memref<8x8x128xf32, #tpu.memory_space<vmem>>, vector<1x8x128xf32>
      %105 = vector.shape_cast %104 : vector<1x8x128xf32> to vector<8x128xf32>
      %106 = arith.mulf %7, %93 : vector<8x128xf32>
      %107 = arith.mulf %17, %105 : vector<8x128xf32>
      %108 = arith.addf %106, %107 : vector<8x128xf32>
      %109 = arith.mulf %15, %97 : vector<8x128xf32>
      %110 = arith.mulf %19, %108 : vector<8x128xf32>
      %111 = arith.addf %109, %110 : vector<8x128xf32>
      %112 = arith.subf %111, %101 : vector<8x128xf32>
      %cst_38 = arith.constant 1.000000e+00 : f32
      %113 = vector.broadcast %cst_38 : f32 to vector<8x128xf32>
      %114 = arith.cmpf ogt, %112, %113 : vector<8x128xf32>
      %115 = arith.extui %114 : vector<8x128xi1> to vector<8x128xi32>
      %116 = arith.sitofp %115 : vector<8x128xi32> to vector<8x128xf32>
      %117 = arith.addf %102, %116 : vector<8x128xf32>
      %c5_i32 = arith.constant 5 : i32
      %118 = arith.index_cast %c5_i32 : i32 to index
      %c0_39 = arith.constant 0 : index
      %c0_40 = arith.constant 0 : index
      %119 = vector.load %arg2[%118, %c0_39, %c0_40] : memref<8x8x128xf32, #tpu.memory_space<vmem>>, vector<1x8x128xf32>
      %120 = vector.shape_cast %119 : vector<1x8x128xf32> to vector<8x128xf32>
      %121 = arith.mulf %7, %108 : vector<8x128xf32>
      %122 = arith.mulf %17, %120 : vector<8x128xf32>
      %123 = arith.addf %121, %122 : vector<8x128xf32>
      %124 = arith.mulf %15, %112 : vector<8x128xf32>
      %125 = arith.mulf %19, %123 : vector<8x128xf32>
      %126 = arith.addf %124, %125 : vector<8x128xf32>
      %127 = arith.subf %126, %116 : vector<8x128xf32>
      %cst_41 = arith.constant 1.000000e+00 : f32
      %128 = vector.broadcast %cst_41 : f32 to vector<8x128xf32>
      %129 = arith.cmpf ogt, %127, %128 : vector<8x128xf32>
      %130 = arith.extui %129 : vector<8x128xi1> to vector<8x128xi32>
      %131 = arith.sitofp %130 : vector<8x128xi32> to vector<8x128xf32>
      %132 = arith.addf %117, %131 : vector<8x128xf32>
      %c6_i32 = arith.constant 6 : i32
      %133 = arith.index_cast %c6_i32 : i32 to index
      %c0_42 = arith.constant 0 : index
      %c0_43 = arith.constant 0 : index
      %134 = vector.load %arg2[%133, %c0_42, %c0_43] : memref<8x8x128xf32, #tpu.memory_space<vmem>>, vector<1x8x128xf32>
      %135 = vector.shape_cast %134 : vector<1x8x128xf32> to vector<8x128xf32>
      %136 = arith.mulf %7, %123 : vector<8x128xf32>
      %137 = arith.mulf %17, %135 : vector<8x128xf32>
      %138 = arith.addf %136, %137 : vector<8x128xf32>
      %139 = arith.mulf %15, %127 : vector<8x128xf32>
      %140 = arith.mulf %19, %138 : vector<8x128xf32>
      %141 = arith.addf %139, %140 : vector<8x128xf32>
      %142 = arith.subf %141, %131 : vector<8x128xf32>
      %cst_44 = arith.constant 1.000000e+00 : f32
      %143 = vector.broadcast %cst_44 : f32 to vector<8x128xf32>
      %144 = arith.cmpf ogt, %142, %143 : vector<8x128xf32>
      %145 = arith.extui %144 : vector<8x128xi1> to vector<8x128xi32>
      %146 = arith.sitofp %145 : vector<8x128xi32> to vector<8x128xf32>
      %147 = arith.addf %132, %146 : vector<8x128xf32>
      %c7_i32 = arith.constant 7 : i32
      %148 = arith.index_cast %c7_i32 : i32 to index
      %c0_45 = arith.constant 0 : index
      %c0_46 = arith.constant 0 : index
      %149 = vector.load %arg2[%148, %c0_45, %c0_46] : memref<8x8x128xf32, #tpu.memory_space<vmem>>, vector<1x8x128xf32>
      %150 = vector.shape_cast %149 : vector<1x8x128xf32> to vector<8x128xf32>
      %151 = arith.mulf %7, %138 : vector<8x128xf32>
      %152 = arith.mulf %17, %150 : vector<8x128xf32>
      %153 = arith.addf %151, %152 : vector<8x128xf32>
      %154 = arith.mulf %15, %142 : vector<8x128xf32>
      %155 = arith.mulf %19, %153 : vector<8x128xf32>
      %156 = arith.addf %154, %155 : vector<8x128xf32>
      %157 = arith.subf %156, %146 : vector<8x128xf32>
      %cst_47 = arith.constant 1.000000e+00 : f32
      %158 = vector.broadcast %cst_47 : f32 to vector<8x128xf32>
      %159 = arith.cmpf ogt, %157, %158 : vector<8x128xf32>
      %160 = arith.extui %159 : vector<8x128xi1> to vector<8x128xi32>
      %161 = arith.sitofp %160 : vector<8x128xi32> to vector<8x128xf32>
      %162 = arith.addf %147, %161 : vector<8x128xf32>
      %c8_i32_48 = arith.constant 8 : i32
      %c0_49 = arith.constant 0 : index
      %c0_50 = arith.constant 0 : index
      %163 = vector.load %arg9[%c0_49, %c0_50] : memref<8x128xf32, #tpu.memory_space<vmem>>, vector<8x128xf32>
      tpu.vector_store %arg9[%c0_49, %c0_50], %153 {strides = array<i32>} : memref<8x128xf32, #tpu.memory_space<vmem>>, vector<8x128xf32>,
      %c0_51 = arith.constant 0 : index
      %c0_52 = arith.constant 0 : index
      %164 = vector.load %arg10[%c0_51, %c0_52] : memref<8x128xf32, #tpu.memory_space<vmem>>, vector<8x128xf32>
      tpu.vector_store %arg10[%c0_51, %c0_52], %157 {strides = array<i32>} : memref<8x128xf32, #tpu.memory_space<vmem>>, vector<8x128xf32>,
      %c0_53 = arith.constant 0 : index
      %c0_54 = arith.constant 0 : index
      %165 = vector.load %arg11[%c0_53, %c0_54] : memref<8x128xf32, #tpu.memory_space<vmem>>, vector<8x128xf32>
      tpu.vector_store %arg11[%c0_53, %c0_54], %161 {strides = array<i32>} : memref<8x128xf32, #tpu.memory_space<vmem>>, vector<8x128xf32>,
      %c0_55 = arith.constant 0 : index
      %c0_56 = arith.constant 0 : index
      %166 = vector.load %arg12[%c0_55, %c0_56] : memref<8x128xf32, #tpu.memory_space<vmem>>, vector<8x128xf32>
      tpu.vector_store %arg12[%c0_55, %c0_56], %162 {strides = array<i32>} : memref<8x128xf32, #tpu.memory_space<vmem>>, vector<8x128xf32>,
    } else {
    }
    %true = arith.constant true
    %31 = arith.xori %25, %true : i1
    %true_11 = arith.constant true
    %32 = arith.xori %26, %true_11 : i1
    %33 = arith.andi %31, %32 : i1
    %34 = arith.extui %33 : i1 to i32
    %c0_i32_12 = arith.constant 0 : i32
    %35 = arith.cmpi ne, %34, %c0_i32_12 : i32
    scf.if %35 {
      %c0_14 = arith.constant 0 : index
      %c0_15 = arith.constant 0 : index
      %39 = vector.load %arg9[%c0_14, %c0_15] : memref<8x128xf32, #tpu.memory_space<vmem>>, vector<8x128xf32>
      %c0_16 = arith.constant 0 : index
      %c0_17 = arith.constant 0 : index
      %40 = vector.load %arg10[%c0_16, %c0_17] : memref<8x128xf32, #tpu.memory_space<vmem>>, vector<8x128xf32>
      %c0_18 = arith.constant 0 : index
      %c0_19 = arith.constant 0 : index
      %41 = vector.load %arg11[%c0_18, %c0_19] : memref<8x128xf32, #tpu.memory_space<vmem>>, vector<8x128xf32>
      %c0_20 = arith.constant 0 : index
      %c0_21 = arith.constant 0 : index
      %42 = vector.load %arg12[%c0_20, %c0_21] : memref<8x128xf32, #tpu.memory_space<vmem>>, vector<8x128xf32>
      %c0_i32_22 = arith.constant 0 : i32
      %43 = arith.index_cast %c0_i32_22 : i32 to index
      %c0_23 = arith.constant 0 : index
      %c0_24 = arith.constant 0 : index
      %44 = vector.load %arg2[%43, %c0_23, %c0_24] : memref<8x8x128xf32, #tpu.memory_space<vmem>>, vector<1x8x128xf32>
      %45 = vector.shape_cast %44 : vector<1x8x128xf32> to vector<8x128xf32>
      %46 = arith.mulf %7, %39 : vector<8x128xf32>
      %47 = arith.mulf %17, %45 : vector<8x128xf32>
      %48 = arith.addf %46, %47 : vector<8x128xf32>
      %49 = arith.mulf %15, %40 : vector<8x128xf32>
      %50 = arith.mulf %19, %48 : vector<8x128xf32>
      %51 = arith.addf %49, %50 : vector<8x128xf32>
      %52 = arith.subf %51, %41 : vector<8x128xf32>
      %cst_25 = arith.constant 1.000000e+00 : f32
      %53 = vector.broadcast %cst_25 : f32 to vector<8x128xf32>
      %54 = arith.cmpf ogt, %52, %53 : vector<8x128xf32>
      %55 = arith.extui %54 : vector<8x128xi1> to vector<8x128xi32>
      %56 = arith.sitofp %55 : vector<8x128xi32> to vector<8x128xf32>
      %57 = arith.addi %23, %c0_i32_22 : i32
      %c26_i32_26 = arith.constant 26 : i32
      %58 = arith.cmpi sge, %57, %c26_i32_26 : i32
      %cst_27 = arith.constant 0.000000e+00 : f32
      %59 = vector.broadcast %cst_27 : f32 to vector<8x128xf32>
      %60 = arith.select %58, %56, %59 : vector<8x128xf32>
      %61 = arith.addf %42, %60 : vector<8x128xf32>
      %c1_i32 = arith.constant 1 : i32
      %62 = arith.index_cast %c1_i32 : i32 to index
      %c0_28 = arith.constant 0 : index
      %c0_29 = arith.constant 0 : index
      %63 = vector.load %arg2[%62, %c0_28, %c0_29] : memref<8x8x128xf32, #tpu.memory_space<vmem>>, vector<1x8x128xf32>
      %64 = vector.shape_cast %63 : vector<1x8x128xf32> to vector<8x128xf32>
      %65 = arith.mulf %7, %48 : vector<8x128xf32>
      %66 = arith.mulf %17, %64 : vector<8x128xf32>
      %67 = arith.addf %65, %66 : vector<8x128xf32>
      %68 = arith.mulf %15, %52 : vector<8x128xf32>
      %69 = arith.mulf %19, %67 : vector<8x128xf32>
      %70 = arith.addf %68, %69 : vector<8x128xf32>
      %71 = arith.subf %70, %56 : vector<8x128xf32>
      %cst_30 = arith.constant 1.000000e+00 : f32
      %72 = vector.broadcast %cst_30 : f32 to vector<8x128xf32>
      %73 = arith.cmpf ogt, %71, %72 : vector<8x128xf32>
      %74 = arith.extui %73 : vector<8x128xi1> to vector<8x128xi32>
      %75 = arith.sitofp %74 : vector<8x128xi32> to vector<8x128xf32>
      %76 = arith.addi %23, %c1_i32 : i32
      %c26_i32_31 = arith.constant 26 : i32
      %77 = arith.cmpi sge, %76, %c26_i32_31 : i32
      %cst_32 = arith.constant 0.000000e+00 : f32
      %78 = vector.broadcast %cst_32 : f32 to vector<8x128xf32>
      %79 = arith.select %77, %75, %78 : vector<8x128xf32>
      %80 = arith.addf %61, %79 : vector<8x128xf32>
      %c2_i32 = arith.constant 2 : i32
      %81 = arith.index_cast %c2_i32 : i32 to index
      %c0_33 = arith.constant 0 : index
      %c0_34 = arith.constant 0 : index
      %82 = vector.load %arg2[%81, %c0_33, %c0_34] : memref<8x8x128xf32, #tpu.memory_space<vmem>>, vector<1x8x128xf32>
      %83 = vector.shape_cast %82 : vector<1x8x128xf32> to vector<8x128xf32>
      %84 = arith.mulf %7, %67 : vector<8x128xf32>
      %85 = arith.mulf %17, %83 : vector<8x128xf32>
      %86 = arith.addf %84, %85 : vector<8x128xf32>
      %87 = arith.mulf %15, %71 : vector<8x128xf32>
      %88 = arith.mulf %19, %86 : vector<8x128xf32>
      %89 = arith.addf %87, %88 : vector<8x128xf32>
      %90 = arith.subf %89, %75 : vector<8x128xf32>
      %cst_35 = arith.constant 1.000000e+00 : f32
      %91 = vector.broadcast %cst_35 : f32 to vector<8x128xf32>
      %92 = arith.cmpf ogt, %90, %91 : vector<8x128xf32>
      %93 = arith.extui %92 : vector<8x128xi1> to vector<8x128xi32>
      %94 = arith.sitofp %93 : vector<8x128xi32> to vector<8x128xf32>
      %95 = arith.addi %23, %c2_i32 : i32
      %c26_i32_36 = arith.constant 26 : i32
      %96 = arith.cmpi sge, %95, %c26_i32_36 : i32
      %cst_37 = arith.constant 0.000000e+00 : f32
      %97 = vector.broadcast %cst_37 : f32 to vector<8x128xf32>
      %98 = arith.select %96, %94, %97 : vector<8x128xf32>
      %99 = arith.addf %80, %98 : vector<8x128xf32>
      %c3_i32 = arith.constant 3 : i32
      %100 = arith.index_cast %c3_i32 : i32 to index
      %c0_38 = arith.constant 0 : index
      %c0_39 = arith.constant 0 : index
      %101 = vector.load %arg2[%100, %c0_38, %c0_39] : memref<8x8x128xf32, #tpu.memory_space<vmem>>, vector<1x8x128xf32>
      %102 = vector.shape_cast %101 : vector<1x8x128xf32> to vector<8x128xf32>
      %103 = arith.mulf %7, %86 : vector<8x128xf32>
      %104 = arith.mulf %17, %102 : vector<8x128xf32>
      %105 = arith.addf %103, %104 : vector<8x128xf32>
      %106 = arith.mulf %15, %90 : vector<8x128xf32>
      %107 = arith.mulf %19, %105 : vector<8x128xf32>
      %108 = arith.addf %106, %107 : vector<8x128xf32>
      %109 = arith.subf %108, %94 : vector<8x128xf32>
      %cst_40 = arith.constant 1.000000e+00 : f32
      %110 = vector.broadcast %cst_40 : f32 to vector<8x128xf32>
      %111 = arith.cmpf ogt, %109, %110 : vector<8x128xf32>
      %112 = arith.extui %111 : vector<8x128xi1> to vector<8x128xi32>
      %113 = arith.sitofp %112 : vector<8x128xi32> to vector<8x128xf32>
      %114 = arith.addi %23, %c3_i32 : i32
      %c26_i32_41 = arith.constant 26 : i32
      %115 = arith.cmpi sge, %114, %c26_i32_41 : i32
      %cst_42 = arith.constant 0.000000e+00 : f32
      %116 = vector.broadcast %cst_42 : f32 to vector<8x128xf32>
      %117 = arith.select %115, %113, %116 : vector<8x128xf32>
      %118 = arith.addf %99, %117 : vector<8x128xf32>
      %c4_i32_43 = arith.constant 4 : i32
      %119 = arith.index_cast %c4_i32_43 : i32 to index
      %c0_44 = arith.constant 0 : index
      %c0_45 = arith.constant 0 : index
      %120 = vector.load %arg2[%119, %c0_44, %c0_45] : memref<8x8x128xf32, #tpu.memory_space<vmem>>, vector<1x8x128xf32>
      %121 = vector.shape_cast %120 : vector<1x8x128xf32> to vector<8x128xf32>
      %122 = arith.mulf %7, %105 : vector<8x128xf32>
      %123 = arith.mulf %17, %121 : vector<8x128xf32>
      %124 = arith.addf %122, %123 : vector<8x128xf32>
      %125 = arith.mulf %15, %109 : vector<8x128xf32>
      %126 = arith.mulf %19, %124 : vector<8x128xf32>
      %127 = arith.addf %125, %126 : vector<8x128xf32>
      %128 = arith.subf %127, %113 : vector<8x128xf32>
      %cst_46 = arith.constant 1.000000e+00 : f32
      %129 = vector.broadcast %cst_46 : f32 to vector<8x128xf32>
      %130 = arith.cmpf ogt, %128, %129 : vector<8x128xf32>
      %131 = arith.extui %130 : vector<8x128xi1> to vector<8x128xi32>
      %132 = arith.sitofp %131 : vector<8x128xi32> to vector<8x128xf32>
      %133 = arith.addi %23, %c4_i32_43 : i32
      %c26_i32_47 = arith.constant 26 : i32
      %134 = arith.cmpi sge, %133, %c26_i32_47 : i32
      %cst_48 = arith.constant 0.000000e+00 : f32
      %135 = vector.broadcast %cst_48 : f32 to vector<8x128xf32>
      %136 = arith.select %134, %132, %135 : vector<8x128xf32>
      %137 = arith.addf %118, %136 : vector<8x128xf32>
      %c5_i32 = arith.constant 5 : i32
      %138 = arith.index_cast %c5_i32 : i32 to index
      %c0_49 = arith.constant 0 : index
      %c0_50 = arith.constant 0 : index
      %139 = vector.load %arg2[%138, %c0_49, %c0_50] : memref<8x8x128xf32, #tpu.memory_space<vmem>>, vector<1x8x128xf32>
      %140 = vector.shape_cast %139 : vector<1x8x128xf32> to vector<8x128xf32>
      %141 = arith.mulf %7, %124 : vector<8x128xf32>
      %142 = arith.mulf %17, %140 : vector<8x128xf32>
      %143 = arith.addf %141, %142 : vector<8x128xf32>
      %144 = arith.mulf %15, %128 : vector<8x128xf32>
      %145 = arith.mulf %19, %143 : vector<8x128xf32>
      %146 = arith.addf %144, %145 : vector<8x128xf32>
      %147 = arith.subf %146, %132 : vector<8x128xf32>
      %cst_51 = arith.constant 1.000000e+00 : f32
      %148 = vector.broadcast %cst_51 : f32 to vector<8x128xf32>
      %149 = arith.cmpf ogt, %147, %148 : vector<8x128xf32>
      %150 = arith.extui %149 : vector<8x128xi1> to vector<8x128xi32>
      %151 = arith.sitofp %150 : vector<8x128xi32> to vector<8x128xf32>
      %152 = arith.addi %23, %c5_i32 : i32
      %c26_i32_52 = arith.constant 26 : i32
      %153 = arith.cmpi sge, %152, %c26_i32_52 : i32
      %cst_53 = arith.constant 0.000000e+00 : f32
      %154 = vector.broadcast %cst_53 : f32 to vector<8x128xf32>
      %155 = arith.select %153, %151, %154 : vector<8x128xf32>
      %156 = arith.addf %137, %155 : vector<8x128xf32>
      %c6_i32 = arith.constant 6 : i32
      %157 = arith.index_cast %c6_i32 : i32 to index
      %c0_54 = arith.constant 0 : index
      %c0_55 = arith.constant 0 : index
      %158 = vector.load %arg2[%157, %c0_54, %c0_55] : memref<8x8x128xf32, #tpu.memory_space<vmem>>, vector<1x8x128xf32>
      %159 = vector.shape_cast %158 : vector<1x8x128xf32> to vector<8x128xf32>
      %160 = arith.mulf %7, %143 : vector<8x128xf32>
      %161 = arith.mulf %17, %159 : vector<8x128xf32>
      %162 = arith.addf %160, %161 : vector<8x128xf32>
      %163 = arith.mulf %15, %147 : vector<8x128xf32>
      %164 = arith.mulf %19, %162 : vector<8x128xf32>
      %165 = arith.addf %163, %164 : vector<8x128xf32>
      %166 = arith.subf %165, %151 : vector<8x128xf32>
      %cst_56 = arith.constant 1.000000e+00 : f32
      %167 = vector.broadcast %cst_56 : f32 to vector<8x128xf32>
      %168 = arith.cmpf ogt, %166, %167 : vector<8x128xf32>
      %169 = arith.extui %168 : vector<8x128xi1> to vector<8x128xi32>
      %170 = arith.sitofp %169 : vector<8x128xi32> to vector<8x128xf32>
      %171 = arith.addi %23, %c6_i32 : i32
      %c26_i32_57 = arith.constant 26 : i32
      %172 = arith.cmpi sge, %171, %c26_i32_57 : i32
      %cst_58 = arith.constant 0.000000e+00 : f32
      %173 = vector.broadcast %cst_58 : f32 to vector<8x128xf32>
      %174 = arith.select %172, %170, %173 : vector<8x128xf32>
      %175 = arith.addf %156, %174 : vector<8x128xf32>
      %c7_i32 = arith.constant 7 : i32
      %176 = arith.index_cast %c7_i32 : i32 to index
      %c0_59 = arith.constant 0 : index
      %c0_60 = arith.constant 0 : index
      %177 = vector.load %arg2[%176, %c0_59, %c0_60] : memref<8x8x128xf32, #tpu.memory_space<vmem>>, vector<1x8x128xf32>
      %178 = vector.shape_cast %177 : vector<1x8x128xf32> to vector<8x128xf32>
      %179 = arith.mulf %7, %162 : vector<8x128xf32>
      %180 = arith.mulf %17, %178 : vector<8x128xf32>
      %181 = arith.addf %179, %180 : vector<8x128xf32>
      %182 = arith.mulf %15, %166 : vector<8x128xf32>
      %183 = arith.mulf %19, %181 : vector<8x128xf32>
      %184 = arith.addf %182, %183 : vector<8x128xf32>
      %185 = arith.subf %184, %170 : vector<8x128xf32>
      %cst_61 = arith.constant 1.000000e+00 : f32
      %186 = vector.broadcast %cst_61 : f32 to vector<8x128xf32>
      %187 = arith.cmpf ogt, %185, %186 : vector<8x128xf32>
      %188 = arith.extui %187 : vector<8x128xi1> to vector<8x128xi32>
      %189 = arith.sitofp %188 : vector<8x128xi32> to vector<8x128xf32>
      %190 = arith.addi %23, %c7_i32 : i32
      %c26_i32_62 = arith.constant 26 : i32
      %191 = arith.cmpi sge, %190, %c26_i32_62 : i32
      %cst_63 = arith.constant 0.000000e+00 : f32
      %192 = vector.broadcast %cst_63 : f32 to vector<8x128xf32>
      %193 = arith.select %191, %189, %192 : vector<8x128xf32>
      %194 = arith.addf %175, %193 : vector<8x128xf32>
      %c8_i32_64 = arith.constant 8 : i32
      %c0_65 = arith.constant 0 : index
      %c0_66 = arith.constant 0 : index
      %195 = vector.load %arg9[%c0_65, %c0_66] : memref<8x128xf32, #tpu.memory_space<vmem>>, vector<8x128xf32>
      tpu.vector_store %arg9[%c0_65, %c0_66], %181 {strides = array<i32>} : memref<8x128xf32, #tpu.memory_space<vmem>>, vector<8x128xf32>,
      %c0_67 = arith.constant 0 : index
      %c0_68 = arith.constant 0 : index
      %196 = vector.load %arg10[%c0_67, %c0_68] : memref<8x128xf32, #tpu.memory_space<vmem>>, vector<8x128xf32>
      tpu.vector_store %arg10[%c0_67, %c0_68], %185 {strides = array<i32>} : memref<8x128xf32, #tpu.memory_space<vmem>>, vector<8x128xf32>,
      %c0_69 = arith.constant 0 : index
      %c0_70 = arith.constant 0 : index
      %197 = vector.load %arg11[%c0_69, %c0_70] : memref<8x128xf32, #tpu.memory_space<vmem>>, vector<8x128xf32>
      tpu.vector_store %arg11[%c0_69, %c0_70], %189 {strides = array<i32>} : memref<8x128xf32, #tpu.memory_space<vmem>>, vector<8x128xf32>,
      %c0_71 = arith.constant 0 : index
      %c0_72 = arith.constant 0 : index
      %198 = vector.load %arg12[%c0_71, %c0_72] : memref<8x128xf32, #tpu.memory_space<vmem>>, vector<8x128xf32>
      tpu.vector_store %arg12[%c0_71, %c0_72], %194 {strides = array<i32>} : memref<8x128xf32, #tpu.memory_space<vmem>>, vector<8x128xf32>,
    } else {
    }
    %c4_i32 = arith.constant 4 : i32
    %36 = arith.cmpi eq, %arg1, %c4_i32 : i32
    %37 = arith.extui %36 : i1 to i32
    %c0_i32_13 = arith.constant 0 : i32
    %38 = arith.cmpi ne, %37, %c0_i32_13 : i32
    scf.if %38 {
      %c0_14 = arith.constant 0 : index
      %c0_15 = arith.constant 0 : index
      %39 = vector.load %arg12[%c0_14, %c0_15] : memref<8x128xf32, #tpu.memory_space<vmem>>, vector<8x128xf32>
      %c0_16 = arith.constant 0 : index
      %c0_17 = arith.constant 0 : index
      %40 = vector.load %arg6[%c0_16, %c0_17] : memref<128x10xf32, #tpu.memory_space<vmem>>, vector<128x10xf32>
      %cst_18 = arith.constant dense<0.000000e+00> : vector<8x10xf32>
      %41 = tpu.matmul %39, %40, %cst_18 {dimension_numbers = #tpu.dot_dimension_numbers<[1], [0], [0], [1], [0, 0, 1, 1], [], []>} : vector<8x128xf32>, vector<128x10xf32>, vector<8x10xf32> -> vector<8x10xf32>
      %c0_19 = arith.constant 0 : index
      %c0_20 = arith.constant 0 : index
      %42 = vector.load %arg7[%c0_19, %c0_20] : memref<1x10xf32, #tpu.memory_space<vmem>>, vector<1x10xf32>
      %43 = vector.broadcast %42 : vector<1x10xf32> to vector<8x10xf32>
      %44 = arith.addf %41, %43 : vector<8x10xf32>
      %c0_21 = arith.constant 0 : index
      %c0_22 = arith.constant 0 : index
      %45 = vector.load %arg8[%c0_21, %c0_22] : memref<8x10xf32, #tpu.memory_space<vmem>>, vector<8x10xf32>
      tpu.vector_store %arg8[%c0_21, %c0_22], %44 {strides = array<i32>} : memref<8x10xf32, #tpu.memory_space<vmem>>, vector<8x10xf32>,
    } else {
    }
    return
  }
  func.func @transform_0(%arg0: i32, %arg1: i32) -> (i32, i32, i32) {
    %c0_i32 = arith.constant 0 : i32
    %c0_i32_0 = arith.constant 0 : i32
    return %arg1, %arg0, %c0_i32 : i32, i32, i32
  }
  func.func @transform_1(%arg0: i32, %arg1: i32) -> (i32, i32) {
    %c0_i32 = arith.constant 0 : i32
    %c0_i32_0 = arith.constant 0 : i32
    %c0_i32_1 = arith.constant 0 : i32
    return %c0_i32, %c0_i32_0 : i32, i32
  }
  func.func @transform_2(%arg0: i32, %arg1: i32) -> (i32, i32) {
    %c0_i32 = arith.constant 0 : i32
    %c0_i32_0 = arith.constant 0 : i32
    %c0_i32_1 = arith.constant 0 : i32
    return %c0_i32, %c0_i32_0 : i32, i32
  }
  func.func @transform_3(%arg0: i32, %arg1: i32) -> (i32, i32) {
    %c0_i32 = arith.constant 0 : i32
    %c0_i32_0 = arith.constant 0 : i32
    return %arg0, %c0_i32 : i32, i32
  }
  func.func @transform_4(%arg0: i32, %arg1: i32) -> (i32, i32) {
    %c0_i32 = arith.constant 0 : i32
    %c0_i32_0 = arith.constant 0 : i32
    %c0_i32_1 = arith.constant 0 : i32
    return %c0_i32, %c0_i32_0 : i32, i32
  }
  func.func @transform_5(%arg0: i32, %arg1: i32) -> (i32, i32) {
    %c0_i32 = arith.constant 0 : i32
    %c0_i32_0 = arith.constant 0 : i32
    %c0_i32_1 = arith.constant 0 : i32
    return %c0_i32, %c0_i32_0 : i32, i32
  }
  func.func @transform_6(%arg0: i32, %arg1: i32) -> (i32, i32) {
    %c0_i32 = arith.constant 0 : i32
    %c0_i32_0 = arith.constant 0 : i32
    return %arg0, %c0_i32 : i32, i32
  }
}

</mosaic_0001>

<bundles_post_ra>
// kernel: tpu_custom_call.1
= control target key start
LH: loop header
LB: loop body
LE: loop exit
PB: predicated region body
PF: predicated region fallthrough
CT: control target
= control target key end

     0   :  { %s1758_s0 = inlined_call_operand.hbm [shape: f32[40,16,128], index: 0, kind: input, shape index: {}]   ;;  %s1759_s1 = inlined_call_operand.vmem [shape: f32[1,128], index: 1, kind: input, shape index: {}]   ;;  %s1760_s2 = inlined_call_operand.vmem [shape: f32[1,128], index: 2, kind: input, shape index: {}]   ;;  %s1761_s3 = inlined_call_operand.vmem [shape: f32[16,128], index: 3, kind: input, shape index: {}]   ;;  %s1762_s4 = inlined_call_operand.vmem [shape: f32[128,10], index: 4, kind: input, shape index: {}]   ;;  %s1763_s5 = inlined_call_operand.vmem [shape: f32[1,10], index: 5, kind: input, shape index: {}]   ;;  %s1764_s6 = inlined_call_operand.hbm [shape: f32[16,10], index: 6, kind: output, shape index: {}]  }
   0x1   :  { %1773 = sst [smem:[#allocation20_spill]] %s1764_s6 }
   0x2   :  { %11 = vsyncpa [#allocation7], 0 }
   0x3   :  { %13 = vsyncpa [#allocation7 + $0x1], 0 }
   0x4   :  { %14 = vsyncpa [#allocation8], 0 }
   0x5   :  { %16 = vsyncpa [#allocation8 + $0x1], 0  ;;  %s1291_s21 = smov 0   ;;  %s1293_s22 = smov 0  }
   0x6   :  { %s1295_s23 = smov 0   ;;  %s1297_s24 = smov 0  }
   0x7   :  { %s1299_s25 = smov 0   ;;  %s1301_s26 = smov 0  }
   0x8   :  { %s1303_s27 = smov 0   ;;  %s1305_s28 = smov 0  }
   0x9   :  { %s1307_s29 = smov 0   ;;  %s1309_s30 = smov 0  }
   0xa   :  { %s1311_s7 = smov 0  }
   0xb LB: > { %1774 = sst [smem:[#allocation12_spill]] %s1215_s23  ;;  %s908_s8 = sadd.s32 4294967295, %s1247_s7   ;;  %s1247_s7 = sphi %s1311_s7, %s22_s7   ;;  %s1243_s30 = sphi %s1309_s30, %s1814_s30   ;;  %s1239_s29 = sphi %s1307_s29, %s1813_s29   ;;  %s1235_s28 = sphi %s1305_s28, %s1812_s28   ;;  %s1231_s27 = sphi %s1303_s27, %s1811_s27   ;;  %s1227_s26 = sphi %s1301_s26, %s1810_s26   ;;  %s1223_s25 = sphi %s1299_s25, %s1809_s25   ;;  %s1219_s24 = sphi %s1297_s24, %s1808_s24   ;;  %s1215_s23 = sphi %s1295_s23, %s1801_s23   ;;  %s1211_s22 = sphi %s1293_s22, %s1807_s22   ;;  %s1207_s21 = sphi %s1291_s21, %s1806_s21  }
   0xc   : > { %1775 = sst [smem:[#allocation13_spill]] %s1227_s26  ;;  %s909_s9 = sadd.s32 4294967294, %s1247_s7  }
   0xd   : > { %s31_s10 = sadd.s32 1, %s1239_s29  ;;  %s34_s11 = sadd.s32 1, %s1243_s30 }
   0xe   : > { %p32_p0 = scmp.ge.s32.totalorder %s31_s10, 5  ;;  %s43_s12 = sadd.s32 1, %s1227_s26 }
   0xf   : > { %p50_p1 = scmp.ne.s32.totalorder %s1227_s26, %s1223_s25  ;;  %p51_p2 = scmp.eq.s32.totalorder %s1247_s7, 0 }
  0x10   : > { %s1816_s10 = smov (%p32_p0, %s31_s10), 0  ;;  %s1818_s11 = smov (!%p32_p0, %s34_s11), %s1243_s30 }
  0x11   : > { %1776 = sst [smem:[#allocation14_spill]] %s1816_s10  ;;  %s38_s13 = ssub.s32 %s1239_s29, %s1816_s10 }
  0x12   : > { %p1357_p3 = por %p51_p2, %p50_p1  ;;  %p36_p4 = scmp.ge.s32.totalorder %s1818_s11, 2 }
  0x13   : > { %p56_p5 = scmp.ne.s32.totalorder %s1223_s25, %s1219_s24  ;;  %p57_p6 = scmp.eq.s32.totalorder %s908_s8, 0 }
  0x14   : > { %s179_s15 = sadd.s32 1, %s1215_s23  ;;  %s1820_s11 = smov (%p36_p4, %s1818_s11), 0 }
  0x15   : > { %1778 = sst [smem:[#allocation15_spill]] %s1820_s11  ;;  %p1365_p7 = por %p57_p6, %p56_p5 }
  0x16   : > { %p189_p8 = scmp.ne.s32.totalorder %s1215_s23, %s1211_s22  ;;  %s39_s17 = ssub.s32 %s1243_s30, %s1820_s11 }
  0x17   : > { %p190_p9 = scmp.eq.s32.totalorder %s908_s8, 9  ;;  %s40_s18 = sor.u32 %s39_s17, %s38_s13 }
  0x18   : > { %p177_p10 = scmp.eq.s32.totalorder %s39_s17, 0  ;;  %p41_p11 = scmp.eq.s32.totalorder %s40_s18, 0 }
  0x19   : > { %p1373_p12 = por %p190_p9, %p189_p8  ;;  %p195_p13 = scmp.ne.s32.totalorder %s1211_s22, %s1207_s21 }
  0x1a   : > { %s1378_s20 = scalar_select %p177_p10, %s1215_s23, %s179_s15  }
  0x1b   : > { %s1780_s19 = scalar_select %p1373_p12, 1, 0 }
  0x1c   : > { %1782 = sst [smem:[#allocation17_spill]] %s1378_s20  ;;  %p196_p0 = scmp.eq.s32.totalorder %s909_s9, 9 }
  0x1d   : > { %1781 = sst [smem:[#allocation16_spill]] %s1780_s19  ;;  %p989_p1 = scmp.lt.s32.totalorder %s1247_s7, 10 }
  0x1e   : > { %s1381_s24 = scalar_select %p41_p11, %s1227_s26, %s43_s12  }
  0x1f   : > { %p1386_p2 = por %p196_p0, %p195_p13  ;;  %s228_s8 = sand.u32 1, %s1227_s26  }
  0x20   : > { %1783 = sst [smem:[#allocation18_spill]] %s1381_s24  ;;  %s912_s13 = sshll.u32 %s228_s8, 6 }
  0x21   : > { %s1784_s10 = scalar_select %p1386_p2, 1, 0 }
  0x22   : > { %s976_s17 = sshll.u32 %s1239_s29, 4  ;;  %s232_s11 = scalar_lea.vmem [#allocation6], %s912_s13 }
  0x23   : > { %1785 = sst [smem:[#allocation19_spill]] %s1784_s10  ;;  %s237_s18 = sadd.s32 %s1243_s30, %s976_s17 }
  0x24   : > { %s242_s6 = sshll.u32 %s232_s11, 4  ;;  %s915_s19 = sshll.u32 %s237_s18, 3  ;;  %s243_s6 = int_to_ptr.vmem [resolvable:$true] %s242_s6 }
  0x25   : > { %s239_s24 = scalar_lea.hbm %s1758_s0, %s915_s19  ;;  %p982_p4 = pnand %p989_p1, %p1357_p3 }
  0x26   : > { %s240_s9 = sshll.u32 %s239_s24, 4  ;;  %s229_s20 = scalar_lea.sflag [#allocation7], %s228_s8  ;;  %s241_s9 = int_to_ptr.hbm [resolvable:$true] %s240_s9 }
  0x27   : > { %s1249_s23 = smov 256   ;;  %s1250_s26 = smov 128  }
  0x28   : > { %s1251_s10 = smov 8   ;;  %p916_p5 = scmp.ge.s32.totalorder %s1247_s7, 1 }
  0x29   : > { %984 = dma.hbm_to_vmem [thread:$0]  (!%p982_p4), %s241_s9, 1024, %s243_s6, %s229_s20, %s1249_s23, %s1250_s26, %s1251_s10  }
  0x2a   : > { %p257_p6 = scmp.lt.s32.totalorder %s1247_s7, 11 }
  0x2c   : > { %p258_p8 = pnand %p916_p5, %p257_p6 }
  0x2d   : > { %s263_s11 = sand.u32 (!%p258_p8), 1, %s1223_s25  }
  0x2e   : > { %261 = sbr.rel (%p258_p8) target bundleno = 477 (0x1dd), region = 44  ;;  %s917_s13 = sshll.u32 (!%p258_p8), %s263_s11, 6 }
  0x2f   : > { %s264_s17 = scalar_lea.sflag (!%p258_p8), [#allocation7], %s263_s11  ;;  %s1401_s18 = scalar_lea.vmem (!%p258_p8), [#allocation6], %s917_s13 }
  0x33   : > { %1198 = dma.done.wait (%p1365_p7), %s264_s17, 1024  }
  0x34   : > { %1200 = vsyncadd (%p1365_p7), %s264_s17, 4294966272  ;;  %s298_s6 = sand.u32 1, %s1211_s22   ;;  %p302_p3 = scmp.lt.s32.totalorder %s1235_s28, 1  ;;  %v306_v0 = vld [vmem:[%s1759_s1] sm:$0x1] }
  0x35   : > { %s1411_s23 = sshll.u32 %s298_s6, 3  ;;  %v329_v1 = vld [vmem:[%s1760_s2] sm:$0x1]  ;;  %v920_v2 = vmul.f32 -1.442695, %v306_v0  ;;  %p922_p7 = scmp.ne.s32.totalorder %s1231_s27, 0 }
  0x36   : > { %s303_s26 = scalar_select %p302_p3, %s1235_s28, 1  ;;  %v921_v3 = vmul.f32 -1.442695, %v329_v1 }
  0x37   : > { %1086 = vpow2.f32 %v920_v2  ;;  %s300_s12 = scalar_lea.vmem [#allocation9], %s1411_s23 }
  0x38   : > { %s919_s10 = sshll.u32 %s303_s26, 3  ;;  %1088 = vpow2.f32 %v921_v3 }
  0x39   : > { %s1417_s20 = scalar_lea.vmem %s1761_s3, %s919_s10 }
  0x3d   : > { %v1087_v4 = vpop.eup %1086 }
  0x3e   : > { %v1089_v5 = vpop.eup %1088  ;;  %v310_v6 = vadd.f32 1.0, %v1087_v4 }
  0x3f   : > { %v333_v7 = vadd.f32 1.0, %v1089_v5 }
  0x40   : > { %1090 = vrcp.f32 %v310_v6  ;;  %vm316_vm0 = vweird.f32 %v310_v6  ;;  %v322_v11 = vand.u32 2147483648, %v310_v6  ;;  %v320_v14 = vand.u32 2147483647, %v310_v6 }
  0x41   : > { %1092 = vrcp.f32 %v333_v7  ;;  %v345_v15 = vand.u32 2147483648, %v333_v7  ;;  %vm339_vm2 = vweird.f32 %v333_v7  ;;  %v343_v17 = vand.u32 2147483647, %v333_v7 }
  0x42   : > { %v323_v19 = vor.u32 1.1754944e-38, %v322_v11  ;;  %vm321_vm5 = vcmp.eq.f32.partialorder %v320_v14, 8.507059e+37 }
  0x43   : > { %v346_v22 = vor.u32 1.1754944e-38, %v345_v15  ;;  %vm344_vm7 = vcmp.eq.f32.partialorder %v343_v17, 8.507059e+37 }
  0x46   : > { %v1091_v8 = vpop.eup %1090 }
  0x47   : > { %v1093_v9 = vpop.eup %1092  ;;  %v312_v10 = vmul.f32 %v1091_v8, %v310_v6  ;;  %vm317_vm1 = vweird.f32 %v1091_v8 }
  0x48   : > { %v335_v12 = vmul.f32 %v1093_v9, %v333_v7  ;;  %vm340_vm3 = vweird.f32 %v1093_v9  ;;  %vm318_vm4 = vmor %vm316_vm0, %vm317_vm1 }
  0x49   : > { %v313_v13 = vsub.f32 1.0, %v312_v10  ;;  %vm341_vm6 = vmor %vm339_vm2, %vm340_vm3 }
  0x4a   : > { %v336_v16 = vsub.f32 1.0, %v335_v12 }
  0x4b   : > { %v314_v18 = vmul.f32 %v1091_v8, %v313_v13 }
  0x4c   : > { %v337_v20 = vmul.f32 %v1093_v9, %v336_v16 }
  0x4d   : > { %v315_v21 = vadd.f32 %v1091_v8, %v314_v18 }
  0x4e   : > { %v338_v23 = vadd.f32 %v1093_v9, %v337_v20 }
  0x4f   : > { %v319_v24 = vsel %vm318_vm4, %v1091_v8, %v315_v21 }
  0x50   : > { %v324_v25 = vsel %vm321_vm5, %v323_v19, %v319_v24  ;;  %v342_v26 = vsel %vm341_vm6, %v1093_v9, %v338_v23  ;;  %357 = sbr.rel (%p922_p7) target bundleno = 90 (0x5a), region = 52 }
  0x51   : > { %v1425_v27 = vperm.slane %v324_v25, 0  ;;  %v347_v28 = vsel %vm344_vm7, %v346_v22, %v342_v26 }
  0x52   : > { %v1427_v29 = vperm.slane %v347_v28, 0 }
  0x53   : > { %v1430_v30 = vsub.f32 1.0, %v1425_v27 }
  0x54   : > { %v1433_v31 = vsub.f32 1.0, %v1427_v29 }
  0x55   : > { %v1252_v32 = vmov 0.0   ;;  %v359_v33 = vld [vmem:[%s1417_s20] sm:$0xff] }
  0x56   : > { %358 = vst [vmem:[#allocation2] sm:$0xff] %v1252_v32 }
  0x57   : > { %361 = vst [vmem:[#allocation4] sm:$0xff] %v1252_v32 }
  0x58   : > { %362 = vst [vmem:[#allocation5] sm:$0xff] %v1252_v32 }
  0x59   : > { %360 = vst [vmem:[#allocation3] sm:$0xff] %v359_v33 }
  0x5a PF: > { %s1439_s9 = sshll.u32 %s1231_s27, 3 }
  0x5b   : > { %s364_s11 = sadd.s32 8, %s1439_s9  ;;  %p366_p9 = scmp.ge.s32.totalorder %s1439_s9, 26 }
  0x5c   : > { %p1443_p10 = scmp.gt.s32.totalorder %s364_s11, 26 }
  0x5e   : > { %369 = sbr.rel (%p1443_p10) target bundleno = 156 (0x9c), region = 56 }
  0x63   : > { %v370_v34 = vld [vmem:[#allocation2] sm:$0xff]  ;;  %v926_v36 = vld [vmem:[%s1401_s18 + $0x8] sm:$0xff]  ;;  %v928_v42 = vld [vmem:[%s1401_s18 + $0x10] sm:$0xff]  ;;  %v1253_v58 = vmov 0.0  }
  0x64   : > { %v374_v35 = vld [vmem:[%s1401_s18] sm:$0xff]  ;;  %v375_v37 = vmul.f32 %v370_v34, %v1425_v27  ;;  %v388_v40 = vmul.f32 %v926_v36, %v1430_v30  ;;  %v371_v41 = vld [vmem:[#allocation3] sm:$0xff]  ;;  %v372_v46 = vld [vmem:[#allocation4] sm:$0xff]  ;;  %v400_v48 = vmul.f32 %v928_v42, %v1430_v30 }
  0x65   : > { %v376_v38 = vmul.f32 %v374_v35, %v1430_v30  ;;  %v378_v43 = vmul.f32 %v371_v41, %v1427_v29  ;;  %v930_v50 = vld [vmem:[%s1401_s18 + $0x18] sm:$0xff]  ;;  %v932_v57 = vld [vmem:[%s1401_s18 + $0x20] sm:$0xff]  ;;  %v934_v2 = vld [vmem:[%s1401_s18 + $0x28] sm:$0xff] }
  0x66   : > { %v412_v55 = vmul.f32 %v930_v50, %v1430_v30  ;;  %v424_v0 = vmul.f32 %v932_v57, %v1430_v30  ;;  %v436_v7 = vmul.f32 %v934_v2, %v1430_v30  ;;  %v936_v9 = vld [vmem:[%s1401_s18 + $0x30] sm:$0xff]  ;;  %v938_v16 = vld [vmem:[%s1401_s18 + $0x38] sm:$0xff] }
  0x67   : > { %v377_v39 = vadd.f32 %v376_v38, %v375_v37  ;;  %v448_v14 = vmul.f32 %v936_v9, %v1430_v30  ;;  %v460_v22 = vmul.f32 %v938_v16, %v1430_v30 }
  0x69   : > { %v387_v44 = vmul.f32 %v377_v39, %v1425_v27  ;;  %v379_v45 = vmul.f32 %v377_v39, %v1433_v31 }
  0x6b   : > { %v389_v47 = vadd.f32 %v388_v40, %v387_v44  ;;  %v380_v49 = vadd.f32 %v379_v45, %v378_v43 }
  0x6d   : > { %v391_v51 = vmul.f32 %v389_v47, %v1433_v31  ;;  %v399_v52 = vmul.f32 %v389_v47, %v1425_v27  ;;  %v381_v53 = vsub.f32 %v380_v49, %v372_v46 }
  0x6f   : > { %v401_v54 = vadd.f32 %v400_v48, %v399_v52  ;;  %vm382_vm8 = vcmp.gt.f32.partialorder %v381_v53, 1.0  ;;  %v390_v56 = vmul.f32 %v381_v53, %v1427_v29 }
  0x70   : > { %v925_v59 = vsel %vm382_vm8, 1.0, %v1253_v58 }
  0x71   : > { %v411_v60 = vmul.f32 %v401_v54, %v1425_v27  ;;  %v392_v61 = vadd.f32 %v391_v51, %v390_v56  ;;  %v403_v62 = vmul.f32 %v401_v54, %v1433_v31 }
  0x73   : > { %v413_v63 = vadd.f32 %v412_v55, %v411_v60  ;;  %v393_v1 = vsub.f32 %v392_v61, %v925_v59 }
  0x75   : > { %v423_v3 = vmul.f32 %v413_v63, %v1425_v27  ;;  %vm394_vm9 = vcmp.gt.f32.partialorder %v393_v1, 1.0  ;;  %v402_v4 = vmul.f32 %v393_v1, %v1427_v29  ;;  %v415_v10 = vmul.f32 %v413_v63, %v1433_v31 }
  0x76   : > { %v927_v5 = vsel %vm394_vm9, 1.0, %v1253_v58 }
  0x77   : > { %v425_v6 = vadd.f32 %v424_v0, %v423_v3  ;;  %v404_v8 = vadd.f32 %v403_v62, %v402_v4 }
  0x79   : > { %v435_v11 = vmul.f32 %v425_v6, %v1425_v27  ;;  %v405_v12 = vsub.f32 %v404_v8, %v927_v5  ;;  %v427_v20 = vmul.f32 %v425_v6, %v1433_v31 }
  0x7b   : > { %v437_v13 = vadd.f32 %v436_v7, %v435_v11  ;;  %vm406_vm10 = vcmp.gt.f32.partialorder %v405_v12, 1.0  ;;  %v414_v15 = vmul.f32 %v405_v12, %v1427_v29 }
  0x7c   : > { %v929_v17 = vsel %vm406_vm10, 1.0, %v1253_v58 }
  0x7d   : > { %v447_v18 = vmul.f32 %v437_v13, %v1425_v27  ;;  %v416_v19 = vadd.f32 %v415_v10, %v414_v15  ;;  %v439_v33 = vmul.f32 %v437_v13, %v1433_v31 }
  0x7f   : > { %v449_v21 = vadd.f32 %v448_v14, %v447_v18  ;;  %v417_v23 = vsub.f32 %v416_v19, %v929_v17 }
  0x81   : > { %v459_v24 = vmul.f32 %v449_v21, %v1425_v27  ;;  %vm418_vm11 = vcmp.gt.f32.partialorder %v417_v23, 1.0  ;;  %v426_v25 = vmul.f32 %v417_v23, %v1427_v29  ;;  %v451_v38 = vmul.f32 %v449_v21, %v1433_v31 }
  0x82   : > { %v931_v26 = vsel %vm418_vm11, 1.0, %v1253_v58 }
  0x83   : > { %v461_v28 = vadd.f32 %v460_v22, %v459_v24  ;;  %v428_v32 = vadd.f32 %v427_v20, %v426_v25 }
  0x85   : > { %469 = vst [vmem:[#allocation2] sm:$0xff] %v461_v28  ;;  %v429_v34 = vsub.f32 %v428_v32, %v931_v26  ;;  %v463_v43 = vmul.f32 %v461_v28, %v1433_v31 }
  0x87   : > { %vm430_vm12 = vcmp.gt.f32.partialorder %v429_v34, 1.0  ;;  %v438_v35 = vmul.f32 %v429_v34, %v1427_v29 }
  0x88   : > { %v933_v36 = vsel %vm430_vm12, 1.0, %v1253_v58 }
  0x89   : > { %v440_v37 = vadd.f32 %v439_v33, %v438_v35 }
  0x8b   : > { %v441_v39 = vsub.f32 %v440_v37, %v933_v36 }
  0x8d   : > { %vm442_vm13 = vcmp.gt.f32.partialorder %v441_v39, 1.0  ;;  %v450_v40 = vmul.f32 %v441_v39, %v1427_v29 }
  0x8e   : > { %v935_v41 = vsel %vm442_vm13, 1.0, %v1253_v58 }
  0x8f   : > { %v452_v42 = vadd.f32 %v451_v38, %v450_v40 }
  0x91   : > { %v453_v44 = vsub.f32 %v452_v42, %v935_v41 }
  0x93   : > { %vm454_vm14 = vcmp.gt.f32.partialorder %v453_v44, 1.0  ;;  %v462_v45 = vmul.f32 %v453_v44, %v1427_v29 }
  0x94   : > { %v937_v46 = vsel %vm454_vm14, 1.0, %v1253_v58 }
  0x95   : > { %v464_v47 = vadd.f32 %v463_v43, %v462_v45 }
  0x97   : > { %v465_v48 = vsub.f32 %v464_v47, %v937_v46 }
  0x99   : > { %470 = vst [vmem:[#allocation3] sm:$0xff] %v465_v48  ;;  %vm466_vm15 = vcmp.gt.f32.partialorder %v465_v48, 1.0 }
  0x9a   : > { %v939_v49 = vsel %vm466_vm15, 1.0, %v1253_v58 }
  0x9b   : > { %471 = vst [vmem:[#allocation4] sm:$0xff] %v939_v49 }
  0x9c PF: > { %p940_p11 = scmp.lt.s32.totalorder %s1439_s9, 26 }
  0x9e   : > { %475 = sbr.rel (%p940_p11) target bundleno = 222 (0xde), region = 60 }
  0xa3   : > { %v476_v50 = vld [vmem:[#allocation2] sm:$0xff]  ;;  %v942_v52 = vld [vmem:[%s1401_s18 + $0x8] sm:$0xff]  ;;  %v944_v58 = vld [vmem:[%s1401_s18 + $0x10] sm:$0xff]  ;;  %v1254_v10 = vmov 0.0  }
  0xa4   : > { %v480_v51 = vld [vmem:[%s1401_s18] sm:$0xff]  ;;  %v481_v53 = vmul.f32 %v476_v50, %v1425_v27  ;;  %v495_v56 = vmul.f32 %v942_v52, %v1430_v30  ;;  %v477_v57 = vld [vmem:[#allocation3] sm:$0xff]  ;;  %v478_v62 = vld [vmem:[#allocation4] sm:$0xff]  ;;  %v508_v0 = vmul.f32 %v944_v58, %v1430_v30 }
  0xa5   : > { %v482_v54 = vmul.f32 %v480_v51, %v1430_v30  ;;  %v484_v59 = vmul.f32 %v477_v57, %v1427_v29  ;;  %v946_v2 = vld [vmem:[%s1401_s18 + $0x18] sm:$0xff]  ;;  %v948_v9 = vld [vmem:[%s1401_s18 + $0x20] sm:$0xff]  ;;  %v950_v18 = vld [vmem:[%s1401_s18 + $0x28] sm:$0xff] }
  0xa6   : > { %v521_v7 = vmul.f32 %v946_v2, %v1430_v30  ;;  %v534_v16 = vmul.f32 %v948_v9, %v1430_v30  ;;  %v547_v23 = vmul.f32 %v950_v18, %v1430_v30  ;;  %v952_v25 = vld [vmem:[%s1401_s18 + $0x30] sm:$0xff]  ;;  %v954_v35 = vld [vmem:[%s1401_s18 + $0x38] sm:$0xff] }
  0xa7   : > { %v483_v55 = vadd.f32 %v482_v54, %v481_v53  ;;  %v560_v34 = vmul.f32 %v952_v25, %v1430_v30  ;;  %v479_v38 = vld [vmem:[#allocation5] sm:$0xff]  ;;  %v573_v41 = vmul.f32 %v954_v35, %v1430_v30 }
  0xa9   : > { %v494_v60 = vmul.f32 %v483_v55, %v1425_v27  ;;  %v485_v61 = vmul.f32 %v483_v55, %v1433_v31 }
  0xab   : > { %v496_v63 = vadd.f32 %v495_v56, %v494_v60  ;;  %v486_v1 = vadd.f32 %v485_v61, %v484_v59 }
  0xad   : > { %v498_v3 = vmul.f32 %v496_v63, %v1433_v31  ;;  %v507_v4 = vmul.f32 %v496_v63, %v1425_v27  ;;  %v487_v5 = vsub.f32 %v486_v1, %v478_v62 }
  0xaf   : > { %v509_v6 = vadd.f32 %v508_v0, %v507_v4  ;;  %vm488_vm0 = vcmp.gt.f32.partialorder %v487_v5, 1.0  ;;  %v497_v8 = vmul.f32 %v487_v5, %v1427_v29 }
  0xb0   : > { %v941_v11 = vsel %vm488_vm0, 1.0, %v1254_v10 }
  0xb1   : > { %v520_v12 = vmul.f32 %v509_v6, %v1425_v27  ;;  %v499_v13 = vadd.f32 %v498_v3, %v497_v8  ;;  %v511_v14 = vmul.f32 %v509_v6, %v1433_v31  ;;  %v491_v45 = vadd.f32 %v941_v11, %v479_v38 }
  0xb3   : > { %v522_v15 = vadd.f32 %v521_v7, %v520_v12  ;;  %v500_v17 = vsub.f32 %v499_v13, %v941_v11 }
  0xb5   : > { %v533_v19 = vmul.f32 %v522_v15, %v1425_v27  ;;  %vm501_vm1 = vcmp.gt.f32.partialorder %v500_v17, 1.0  ;;  %v510_v20 = vmul.f32 %v500_v17, %v1427_v29  ;;  %v524_v26 = vmul.f32 %v522_v15, %v1433_v31 }
  0xb6   : > { %v943_v21 = vsel %vm501_vm1, 1.0, %v1254_v10 }
  0xb7   : > { %v535_v22 = vadd.f32 %v534_v16, %v533_v19  ;;  %v512_v24 = vadd.f32 %v511_v14, %v510_v20  ;;  %v504_v51 = vadd.f32 %v943_v21, %v491_v45 }
  0xb9   : > { %v546_v28 = vmul.f32 %v535_v22, %v1425_v27  ;;  %v513_v32 = vsub.f32 %v512_v24, %v943_v21  ;;  %v537_v42 = vmul.f32 %v535_v22, %v1433_v31 }
  0xbb   : > { %v548_v33 = vadd.f32 %v547_v23, %v546_v28  ;;  %vm514_vm2 = vcmp.gt.f32.partialorder %v513_v32, 1.0  ;;  %v523_v36 = vmul.f32 %v513_v32, %v1427_v29 }
  0xbc   : > { %v945_v37 = vsel %vm514_vm2, 1.0, %v1254_v10 }
  0xbd   : > { %v559_v39 = vmul.f32 %v548_v33, %v1425_v27  ;;  %v525_v40 = vadd.f32 %v524_v26, %v523_v36  ;;  %v550_v52 = vmul.f32 %v548_v33, %v1433_v31  ;;  %v517_v55 = vadd.f32 %v945_v37, %v504_v51 }
  0xbf   : > { %v561_v43 = vadd.f32 %v560_v34, %v559_v39  ;;  %v526_v44 = vsub.f32 %v525_v40, %v945_v37 }
  0xc1   : > { %v572_v46 = vmul.f32 %v561_v43, %v1425_v27  ;;  %vm527_vm3 = vcmp.gt.f32.partialorder %v526_v44, 1.0  ;;  %v536_v47 = vmul.f32 %v526_v44, %v1427_v29  ;;  %v563_v58 = vmul.f32 %v561_v43, %v1433_v31 }
  0xc2   : > { %v947_v48 = vsel %vm527_vm3, 1.0, %v1254_v10 }
  0xc3   : > { %v574_v49 = vadd.f32 %v573_v41, %v572_v46  ;;  %v538_v50 = vadd.f32 %v537_v42, %v536_v47  ;;  %v530_v60 = vadd.f32 %v947_v48, %v517_v55 }
  0xc5   : > { %583 = vst [vmem:[#allocation2] sm:$0xff] %v574_v49  ;;  %v539_v53 = vsub.f32 %v538_v50, %v947_v48  ;;  %v576_v1 = vmul.f32 %v574_v49, %v1433_v31 }
  0xc7   : > { %vm540_vm4 = vcmp.gt.f32.partialorder %v539_v53, 1.0  ;;  %v549_v54 = vmul.f32 %v539_v53, %v1427_v29 }
  0xc8   : > { %v949_v56 = vsel %vm540_vm4, 1.0, %v1254_v10 }
  0xc9   : > { %v551_v57 = vadd.f32 %v550_v52, %v549_v54  ;;  %v543_v0 = vadd.f32 %v949_v56, %v530_v60 }
  0xcb   : > { %v552_v59 = vsub.f32 %v551_v57, %v949_v56 }
  0xcd   : > { %vm553_vm5 = vcmp.gt.f32.partialorder %v552_v59, 1.0  ;;  %v562_v61 = vmul.f32 %v552_v59, %v1427_v29 }
  0xce   : > { %v951_v62 = vsel %vm553_vm5, 1.0, %v1254_v10 }
  0xcf   : > { %v564_v63 = vadd.f32 %v563_v58, %v562_v61  ;;  %v556_v4 = vadd.f32 %v951_v62, %v543_v0 }
  0xd1   : > { %v565_v2 = vsub.f32 %v564_v63, %v951_v62 }
  0xd3   : > { %vm566_vm6 = vcmp.gt.f32.partialorder %v565_v2, 1.0  ;;  %v575_v3 = vmul.f32 %v565_v2, %v1427_v29 }
  0xd4   : > { %v953_v5 = vsel %vm566_vm6, 1.0, %v1254_v10 }
  0xd5   : > { %v577_v6 = vadd.f32 %v576_v1, %v575_v3  ;;  %v569_v8 = vadd.f32 %v953_v5, %v556_v4 }
  0xd7   : > { %v578_v7 = vsub.f32 %v577_v6, %v953_v5 }
  0xd9   : > { %584 = vst [vmem:[#allocation3] sm:$0xff] %v578_v7  ;;  %vm579_vm7 = vcmp.gt.f32.partialorder %v578_v7, 1.0 }
  0xda   : > { %v955_v9 = vsel %vm579_vm7, 1.0, %v1254_v10 }
  0xdb   : > { %585 = vst [vmem:[#allocation4] sm:$0xff] %v955_v9  ;;  %v582_v11 = vadd.f32 %v955_v9, %v569_v8 }
  0xdd   : > { %586 = vst [vmem:[#allocation5] sm:$0xff] %v582_v11 }
  0xde PF: > { %p589_p13 = pnand %p940_p11, %p1443_p10 }
  0xdf   : > { %s625_s17 = sadd.s32 (!%p589_p13), 1, %s1439_s9  ;;  %s644_s14 = sadd.s32 (!%p589_p13), 2, %s1439_s9 }
  0xe0   : > { %592 = sbr.rel (%p589_p13) target bundleno = 289 (0x121), region = 64  ;;  %p1567_p0 = scmp.ge.s32.totalorder (!%p589_p13), %s625_s17, 26 }
  0xe1   : > { %p1576_p1 = scmp.ge.s32.totalorder (!%p589_p13), %s644_s14, 26  ;;  %s663_s24 = sadd.s32 (!%p589_p13), 3, %s1439_s9 }
  0xe2   : > { %p1596_p4 = scmp.ge.s32.totalorder (!%p589_p13), %s663_s24, 26  ;;  %s682_s15 = sadd.s32 (!%p589_p13), 4, %s1439_s9 }
  0xe3   : > { %p1606_p5 = scmp.ge.s32.totalorder (!%p589_p13), %s682_s15, 26  ;;  %s701_s13 = sadd.s32 (!%p589_p13), 5, %s1439_s9 }
  0xe4   : > { %p1620_p6 = scmp.ge.s32.totalorder (!%p589_p13), %s701_s13, 26 }
  0xe5   : > { %v593_v12 = vld [vmem:[#allocation2] sm:$0xff]  ;;  %v957_v14 = vld [vmem:[%s1401_s18 + $0x8] sm:$0xff]  ;;  %v959_v19 = vld [vmem:[%s1401_s18 + $0x10] sm:$0xff]  ;;  %v1255_v39 = vmov 0.0   ;;  %s608_s26 = scalar_select %p366_p9, 1, 0 }
  0xe6   : > { %v597_v13 = vld [vmem:[%s1401_s18] sm:$0xff]  ;;  %v598_v15 = vmul.f32 %v593_v12, %v1425_v27  ;;  %v616_v17 = vmul.f32 %v957_v14, %v1430_v30  ;;  %v594_v18 = vld [vmem:[#allocation3] sm:$0xff]  ;;  %v595_v23 = vld [vmem:[#allocation4] sm:$0xff]  ;;  %v635_v25 = vmul.f32 %v959_v19, %v1430_v30  ;;  %s627_s20 = scalar_select %p1567_p0, 1, 0 }
  0xe7   : > { %v599_v10 = vmul.f32 %v597_v13, %v1430_v30  ;;  %v601_v20 = vmul.f32 %v594_v18, %v1427_v29  ;;  %v961_v28 = vld [vmem:[%s1401_s18 + $0x18] sm:$0xff]  ;;  %v963_v38 = vld [vmem:[%s1401_s18 + $0x20] sm:$0xff]  ;;  %v965_v47 = vld [vmem:[%s1401_s18 + $0x28] sm:$0xff]  ;;  %v609_v55 = vstv %s608_s26  ;;  %s646_s8 = scalar_select %p1576_p1, 1, 0 }
  0xe8   : > { %v654_v36 = vmul.f32 %v961_v28, %v1430_v30  ;;  %v673_v45 = vmul.f32 %v963_v38, %v1430_v30  ;;  %v692_v52 = vmul.f32 %v965_v47, %v1430_v30  ;;  %v967_v53 = vld [vmem:[%s1401_s18 + $0x30] sm:$0xff]  ;;  %vm1588_vm10 = vcmp.eq.s32.totalorder %v609_v55, 1  ;;  %v969_v62 = vld [vmem:[%s1401_s18 + $0x38] sm:$0xff]  ;;  %s665_s11 = scalar_select %p1596_p4, 1, 0 }
  0xe9   : > { %v600_v16 = vadd.f32 %v599_v10, %v598_v15  ;;  %v711_v59 = vmul.f32 %v967_v53, %v1430_v30  ;;  %v628_v0 = vstv %s627_s20  ;;  %v596_v4 = vld [vmem:[#allocation5] sm:$0xff]  ;;  %v730_v6 = vmul.f32 %v969_v62, %v1430_v30  ;;  %s684_s17 = scalar_select %p1606_p5, 1, 0 }
  0xea   : > { %vm629_vm12 = vcmp.eq.s32.totalorder %v628_v0, 1  ;;  %v647_v11 = vstv %s646_s8  ;;  %s720_s26 = sadd.s32 6, %s1439_s9  ;;  %s739_s20 = sadd.s32 7, %s1439_s9 }
  0xeb   : > { %v615_v21 = vmul.f32 %v600_v16, %v1425_v27  ;;  %v602_v22 = vmul.f32 %v600_v16, %v1433_v31  ;;  %vm648_vm14 = vcmp.eq.s32.totalorder %v647_v11, 1  ;;  %p1625_p8 = scmp.ge.s32.totalorder %s720_s26, 26  ;;  %p1638_p3 = scmp.ge.s32.totalorder %s739_s20, 26 }
  0xec   : > { %s703_s19 = scalar_select %p1620_p6, 1, 0 }
  0xed   : > { %v617_v24 = vadd.f32 %v616_v17, %v615_v21  ;;  %v603_v26 = vadd.f32 %v602_v22, %v601_v20  ;;  %v666_v17 = vstv %s665_s11  ;;  %v685_v22 = vstv %s684_s17  ;;  %s722_s24 = scalar_select %p1625_p8, 1, 0 }
  0xee   : > { %vm667_vm15 = vcmp.eq.s32.totalorder %v666_v17, 1  ;;  %vm686_vm1 = vcmp.eq.s32.totalorder %v685_v22, 1  ;;  %s741_s9 = scalar_select %p1638_p3, 1, 0 }
  0xef   : > { %v619_v32 = vmul.f32 %v617_v24, %v1433_v31  ;;  %v634_v33 = vmul.f32 %v617_v24, %v1425_v27  ;;  %v604_v34 = vsub.f32 %v603_v26, %v595_v23 }
  0xf1   : > { %v636_v35 = vadd.f32 %v635_v25, %v634_v33  ;;  %vm605_vm8 = vcmp.gt.f32.partialorder %v604_v34, 1.0  ;;  %v618_v37 = vmul.f32 %v604_v34, %v1427_v29  ;;  %v704_v33 = vstv %s703_s19 }
  0xf2   : > { %v956_v40 = vsel %vm605_vm8, 1.0, %v1255_v39  ;;  %vm705_vm3 = vcmp.eq.s32.totalorder %v704_v33, 1 }
  0xf3   : > { %v653_v41 = vmul.f32 %v636_v35, %v1425_v27  ;;  %v620_v42 = vadd.f32 %v619_v32, %v618_v37  ;;  %v638_v43 = vmul.f32 %v636_v35, %v1433_v31  ;;  %v611_v5 = vsel %vm1588_vm10, %v956_v40, 0.0 }
  0xf4   : > { %v612_v12 = vadd.f32 %v611_v5, %v596_v4 }
  0xf5   : > { %v655_v44 = vadd.f32 %v654_v36, %v653_v41  ;;  %v621_v46 = vsub.f32 %v620_v42, %v956_v40  ;;  %v723_v40 = vstv %s722_s24 }
  0xf6   : > { %vm724_vm4 = vcmp.eq.s32.totalorder %v723_v40, 1 }
  0xf7   : > { %v672_v48 = vmul.f32 %v655_v44, %v1425_v27  ;;  %vm622_vm9 = vcmp.gt.f32.partialorder %v621_v46, 1.0  ;;  %v637_v49 = vmul.f32 %v621_v46, %v1427_v29  ;;  %v657_v56 = vmul.f32 %v655_v44, %v1433_v31 }
  0xf8   : > { %v958_v50 = vsel %vm622_vm9, 1.0, %v1255_v39 }
  0xf9   : > { %v674_v51 = vadd.f32 %v673_v45, %v672_v48  ;;  %v639_v54 = vadd.f32 %v638_v43, %v637_v49  ;;  %v630_v14 = vsel %vm629_vm12, %v958_v50, 0.0 }
  0xfb   : > { %v691_v57 = vmul.f32 %v674_v51, %v1425_v27  ;;  %v640_v58 = vsub.f32 %v639_v54, %v958_v50  ;;  %v676_v7 = vmul.f32 %v674_v51, %v1433_v31  ;;  %v742_v50 = vstv %s741_s9 }
  0xfc   : > { %vm743_vm6 = vcmp.eq.s32.totalorder %v742_v50, 1 }
  0xfd   : > { %v693_v61 = vadd.f32 %v692_v52, %v691_v57  ;;  %vm641_vm11 = vcmp.gt.f32.partialorder %v640_v58, 1.0  ;;  %v656_v63 = vmul.f32 %v640_v58, %v1427_v29 }
  0xfe   : > { %v960_v1 = vsel %vm641_vm11, 1.0, %v1255_v39 }
  0xff   : > { %v710_v2 = vmul.f32 %v693_v61, %v1425_v27  ;;  %v658_v3 = vadd.f32 %v657_v56, %v656_v63  ;;  %v695_v18 = vmul.f32 %v693_v61, %v1433_v31  ;;  %v649_v20 = vsel %vm648_vm14, %v960_v1, 0.0 }
 0x101   : > { %v712_v8 = vadd.f32 %v711_v59, %v710_v2  ;;  %v659_v9 = vsub.f32 %v658_v3, %v960_v1 }
 0x103   : > { %v729_v13 = vmul.f32 %v712_v8, %v1425_v27  ;;  %vm660_vm13 = vcmp.gt.f32.partialorder %v659_v9, 1.0  ;;  %v675_v30 = vmul.f32 %v659_v9, %v1427_v29  ;;  %v631_v27 = vadd.f32 %v630_v14, %v612_v12 }
 0x104   : > { %v962_v15 = vsel %vm660_vm13, 1.0, %v1255_v39  ;;  %v714_v28 = vmul.f32 %v712_v8, %v1433_v31 }
 0x105   : > { %v731_v10 = vadd.f32 %v730_v6, %v729_v13  ;;  %v677_v16 = vadd.f32 %v676_v7, %v675_v30  ;;  %v650_v24 = vadd.f32 %v649_v20, %v631_v27  ;;  %v668_v26 = vsel %vm667_vm15, %v962_v15, 0.0 }
 0x107   : > { %746 = vst [vmem:[#allocation2] sm:$0xff] %v731_v10  ;;  %v678_v19 = vsub.f32 %v677_v16, %v962_v15  ;;  %v669_v34 = vadd.f32 %v668_v26, %v650_v24  ;;  %v733_v42 = vmul.f32 %v731_v10, %v1433_v31 }
 0x109   : > { %vm679_vm0 = vcmp.gt.f32.partialorder %v678_v19, 1.0  ;;  %v694_v21 = vmul.f32 %v678_v19, %v1427_v29 }
 0x10a   : > { %v964_v23 = vsel %vm679_vm0, 1.0, %v1255_v39 }
 0x10b   : > { %v696_v25 = vadd.f32 %v695_v18, %v694_v21  ;;  %v687_v36 = vsel %vm686_vm1, %v964_v23, 0.0 }
 0x10c   : > { %v688_v41 = vadd.f32 %v687_v36, %v669_v34 }
 0x10d   : > { %v697_v32 = vsub.f32 %v696_v25, %v964_v23 }
 0x10f   : > { %vm698_vm2 = vcmp.gt.f32.partialorder %v697_v32, 1.0  ;;  %v713_v35 = vmul.f32 %v697_v32, %v1427_v29 }
 0x110   : > { %v966_v37 = vsel %vm698_vm2, 1.0, %v1255_v39 }
 0x111   : > { %v715_v38 = vadd.f32 %v714_v28, %v713_v35  ;;  %v706_v44 = vsel %vm705_vm3, %v966_v37, 0.0 }
 0x112   : > { %v707_v47 = vadd.f32 %v706_v44, %v688_v41 }
 0x113   : > { %v716_v43 = vsub.f32 %v715_v38, %v966_v37 }
 0x115   : > { %vm717_vm5 = vcmp.gt.f32.partialorder %v716_v43, 1.0  ;;  %v732_v45 = vmul.f32 %v716_v43, %v1427_v29 }
 0x116   : > { %v968_v46 = vsel %vm717_vm5, 1.0, %v1255_v39 }
 0x117   : > { %v725_v48 = vsel %vm724_vm4, %v968_v46, 0.0  ;;  %v734_v49 = vadd.f32 %v733_v42, %v732_v45 }
 0x118   : > { %v726_v52 = vadd.f32 %v725_v48, %v707_v47 }
 0x119   : > { %v735_v51 = vsub.f32 %v734_v49, %v968_v46 }
 0x11b   : > { %747 = vst [vmem:[#allocation3] sm:$0xff] %v735_v51  ;;  %vm736_vm7 = vcmp.gt.f32.partialorder %v735_v51, 1.0 }
 0x11c   : > { %v970_v31 = vsel %vm736_vm7, 1.0, %v1255_v39 }
 0x11d   : > { %v744_v53 = vsel %vm743_vm6, %v970_v31, 0.0  ;;  %748 = vst [vmem:[#allocation4] sm:$0xff] %v970_v31 }
 0x11e   : > { %v745_v54 = vadd.f32 %v744_v53, %v726_v52 }
 0x120   : > { %749 = vst [vmem:[#allocation5] sm:$0xff] %v745_v54 }
 0x121 PF: > { %p971_p7 = scmp.ne.s32.totalorder %s1231_s27, 4 }
 0x123   : > { %753 = sbr.rel (%p971_p7) target bundleno = 457 (0x1c9), region = 68 }
 0x128   : > { %v770_v29 = vld [vmem:[%s1762_s4 + $0x78] sm:$0xff]  ;;  %v769_v55 = vld [vmem:[%s1762_s4 + $0x70] sm:$0xff]  ;;  %v768_v39 = vld [vmem:[%s1762_s4 + $0x68] sm:$0xff]  ;;  %vm795_vm8 = vcmask 80896  }
 0x129   : > { %775 = vmatpush.msra.mxu0 %v770_v29  ;;  %v767_v56 = vld [vmem:[%s1762_s4 + $0x60] sm:$0xff]  ;;  %v766_v57 = vld [vmem:[%s1762_s4 + $0x58] sm:$0xff]  ;;  %v765_v58 = vld [vmem:[%s1762_s4 + $0x50] sm:$0xff] }
 0x12a   : > { %v764_v59 = vld [vmem:[%s1762_s4 + $0x48] sm:$0xff]  ;;  %v763_v60 = vld [vmem:[%s1762_s4 + $0x40] sm:$0xff]  ;;  %v762_v61 = vld [vmem:[%s1762_s4 + $0x38] sm:$0xff] }
 0x12b   : > { %776 = vmatpush.msra.mxu0 %v769_v55  ;;  %v761_v62 = vld [vmem:[%s1762_s4 + $0x30] sm:$0xff]  ;;  %v760_v63 = vld [vmem:[%s1762_s4 + $0x28] sm:$0xff]  ;;  %v759_v0 = vld [vmem:[%s1762_s4 + $0x20] sm:$0xff] }
 0x12c   : > { %v758_v1 = vld [vmem:[%s1762_s4 + $0x18] sm:$0xff]  ;;  %v757_v2 = vld [vmem:[%s1762_s4 + $0x10] sm:$0xff]  ;;  %v756_v3 = vld [vmem:[%s1762_s4 + $0x8] sm:$0xff] }
 0x12d   : > { %777 = vmatpush.msra.mxu0 %v768_v39  ;;  %v755_v4 = vld [vmem:[%s1762_s4] sm:$0xff]  ;;  %v754_v5 = vld [vmem:[#allocation5] sm:$0xff] }
 0x12e   : > { %v1094_v6 = vld [vmem:[%s1763_s5] ss:$0 sm:$0xff] }
 0x12f   : > { %778 = vmatpush.msra.mxu0 %v767_v56 }
 0x131   : > { %779 = vmatpush.msra.mxu0 %v766_v57 }
 0x133   : > { %780 = vmatpush.msra.mxu0 %v765_v58 }
 0x135   : > { %781 = vmatpush.msra.mxu0 %v764_v59 }
 0x137   : > { %782 = vmatpush.msra.mxu0 %v763_v60 }
 0x139   : > { %783 = vmatpush.msra.mxu0 %v762_v61 }
 0x13b   : > { %784 = vmatpush.msra.mxu0 %v761_v62 }
 0x13d   : > { %785 = vmatpush.msra.mxu0 %v760_v63 }
 0x13f   : > { %786 = vmatpush.msra.mxu0 %v759_v0 }
 0x141   : > { %787 = vmatpush.msra.mxu0 %v758_v1 }
 0x143   : > { %788 = vmatpush.msra.mxu0 %v757_v2 }
 0x145   : > { %789 = vmatpush.msra.mxu0 %v756_v3 }
 0x147   : > { %790 = vmatpush.msra.mxu0 %v755_v4 }
 0x148   : > { %791 = vmatmul.f32.vlgmr.msra.gmra.mxu0 %v754_v5 }
 0x1c5   : > { %v792_v7 = vpop.f32.mrf.mxu0 }
 0x1c6   : > { %v793_v8 = vadd.f32 %v1094_v6, %v792_v7 }
 0x1c8   : > { %796 = vst.msk [vmem:[%s300_s12] sm:$0xff] %vm795_vm8, %v793_v8 }
 0x1c9 PF: > { %s973_s17 = sshll.u32 %s1235_s28, 3  ;;  %s1797_s27 = sld [smem:[#allocation20_spill]] }
 0x1ca   : > { %s810_s20 = sshll.u32 %s300_s12, 4  ;;  %s798_s8 = scalar_lea.sflag [#allocation8], %s298_s6  ;;  %s811_s20 = int_to_ptr.vmem [resolvable:$true] %s810_s20 }
 0x1cf   : > { %s1798_s14 = smov %s1797_s27  ;;  %s808_s19 = scalar_lea.hbm %s1797_s27, %s973_s17 }
 0x1d0   : > { %s812_s24 = sshll.u32 %s808_s19, 4  ;;  %s1145_s18 = scalar_lea.hbm %s1798_s14, 16  ;;  %s813_s24 = int_to_ptr.hbm [resolvable:$true] %s812_s24 }
 0x1d1   : > { %s1139_s9 = sshra.s32 %s813_s24, 4  ;;  %s1140_s9 = int_to_ptr.hbm [resolvable:$true] %s1139_s9 }
 0x1d2   : > { %s1141_s16 = scalar_lea.hbm %s1140_s9, 8  ;;  %p1146_p13 = scmp.lt.s32.totalorder %s1140_s9, %s1798_s14 }
 0x1d3   : > { %p1142_p9 = scmp.ne.s32.totalorder %s1140_s9, %s1141_s16  ;;  %p1147_p0 = scmp.lt.s32.totalorder %s1145_s18, %s1141_s16 }
 0x1d5   : > { %p1143_p10 = pnand %p1142_p9, %p1373_p12  ;;  %p1148_p1 = por %p1147_p0, %p1146_p13 }
 0x1d7   : > { %p1144_p11 = pneg %p1143_p10 }
 0x1d9   : > { %p1149_p4 = pnand %p1148_p1, %p1144_p11 }
 0x1db   : > { %1152 = shalt.err (!%p1149_p4)
}
 0x1dc   : > { %979 = dma.vmem_to_hbm [thread:$0]  (%p1373_p12), %s811_s20, 128, %s813_s24, %s798_s8  }
 0x1dd PF: > { %p990_p5 = scmp.ge.s32.totalorder %s1247_s7, 2  ;;  %s824_s23 = sand.u32 1, %s1207_s21  }
 0x1de   : > { %s825_s12 = scalar_lea.sflag [#allocation8], %s824_s23 }
 0x1df   : > { %p986_p6 = pnand %p990_p5, %p1386_p2 }
 0x1e1   : > { %p987_p8 = pneg %p986_p6 }
 0x1e3   : > { %1202 = dma.done.wait (%p987_p8), %s825_s12, 128  }
 0x1e4   : > { %1204 = vsyncadd (%p987_p8), %s825_s12, 4294967168  ;;  %s22_s7 = sadd.s32 1, %s1247_s7   ;;  %s1800_s26 = sld [smem:[#allocation12_spill]] }
 0x1e5   : > { %p19_p3 = scmp.ge.s32.totalorder %s22_s7, 12   ;;  %s1801_s23 = sld [smem:[#allocation17_spill]] }
 0x1e6   : > { %s1802_s13 = sld [smem:[#allocation13_spill]]  ;;  %s1806_s21 = smov %s1211_s22 }
 0x1e7   : > { %s1803_s10 = sld [smem:[#allocation18_spill]]  ;;  %s1808_s24 = smov %s1223_s25 }
 0x1e8   : > { %s1804_s19 = sld [smem:[#allocation14_spill]]  ;;  %s1811_s27 = smov %s1239_s29 }
 0x1e9   : > { %s1805_s20 = sld [smem:[#allocation15_spill]]  ;;  %s1812_s28 = smov %s1243_s30 }
 0x1ea   : > { %s1807_s22 = smov %s1800_s26 }
 0x1eb   :  { %21 = sbr.rel (!%p19_p3) target bundleno = 11 (0xb), region = 133 }
 0x1ec   : > { %s1809_s25 = smov %s1802_s13 }
 0x1ed   : > { %s1810_s26 = smov %s1803_s10 }
 0x1ee   : > { %s1813_s29 = smov %s1804_s19 }
 0x1ef   : > { %s1814_s30 = smov %s1805_s20 }
 0x1f0   :  { %831 = vsyncpa [#allocation7], 1 }
 0x1f1   :  { %833 = vsyncpa [#allocation7 + $0x1], 1 }
 0x1f2   :  { %834 = vsyncpa [#allocation8], 1 }
 0x1f3   :  { %836 = vsyncpa [#allocation8 + $0x1], 1 }

</bundles_post_ra>
